<compile_context>
chip_gen: v7x
topology: tpu7x:2x2x1
jax: 0.10.0
libtpu: 0.0.40
codegen_flags: <defaults>
</compile_context>

<pallas_src>
import functools

import jax
import jax.numpy as jnp
from jax.experimental import pallas as pl
from jax.experimental.pallas import tpu as pltpu


# ---------------------------------------------------------------------------
# Kernel: per-batch centered cross-correlation A and centered squared norms E0
# ---------------------------------------------------------------------------
def _stats_kernel(yp_ref, y_ref, out_ref):
    """yp_ref, y_ref : (3, TB, N)  component-major, atoms on the lane axis.
    out_ref        : (TB, 10)    [:, 0:9] = A (row-major 3x3), [:, 9] = E0.
    """
    n_atoms = yp_ref.shape[-1]
    inv_n = jnp.float32(1.0 / n_atoms)

    ypc = []
    yc = []
    for d in range(3):
        p = yp_ref[d].astype(jnp.float32)                         # (TB, N)
        q = y_ref[d].astype(jnp.float32)                          # (TB, N)
        p = p - jnp.sum(p, axis=-1, keepdims=True) * inv_n        # center (av1)
        q = q - jnp.sum(q, axis=-1, keepdims=True) * inv_n        # center (av2)
        ypc.append(p)
        yc.append(q)

    # A[d, e] = sum_n ypc_d[n] * yc_e[n]  — full-lane multiplies + lane reduce.
    for d in range(3):
        for e in range(3):
            out_ref[:, 3 * d + e: 3 * d + e + 1] = jnp.sum(
                ypc[d] * yc[e], axis=-1, keepdims=True)

    # E0 = sum |ypc|^2 + sum |yc|^2
    e0 = None
    for d in range(3):
        t = jnp.sum(ypc[d] * ypc[d] + yc[d] * yc[d], axis=-1, keepdims=True)
        e0 = t if e0 is None else e0 + t
    out_ref[:, 9:10] = e0


def _choose_batch_tile(batch, n_atoms, itemsize):
    # ~2 MiB per input block; 2 inputs x 2 pipeline buffers ~ 8 MiB of VMEM for
    # the pipeline plus in-kernel temporaries — comfortably within the scoped
    # VMEM limit on v5e / v6e / v7x (64 MiB physical on v7x).
    block_budget = 2 * 1024 * 1024
    tb = block_budget // max(1, 3 * n_atoms * itemsize)
    tb = max(8, (tb // 8) * 8)        # keep the block sublane dim 8-aligned
    if tb >= batch:
        return batch                  # single block covering all batches
    return tb


# ---------------------------------------------------------------------------
# Full forward: Biopython SVDSuperimposer per batch, averaged RMSD
# ---------------------------------------------------------------------------
@functools.partial(jax.jit, static_argnames=("batch_tile",))
def rmsd_loss_biopython(y_prime, y, batch_tile=None):
    """y_prime, y: (batch, n_atoms, 3). Returns scalar mean RMSD (float32)."""
    B, N, _ = y_prime.shape

    # Lane-dense layout plumbing: (B, N, 3) -> (3, B, N). Native dtype is kept;
    # the upcast to f32 happens inside the kernel (VMEM), halving HBM traffic
    # for bf16/f16 callers.
    yp_t = jnp.transpose(y_prime, (2, 0, 1))
    y_t = jnp.transpose(y, (2, 0, 1))

    itemsize = jnp.dtype(y_prime.dtype).itemsize
    tb = batch_tile if batch_tile is not None else _choose_batch_tile(B, N, itemsize)
    num_tiles = pl.cdiv(B, tb)
    b_pad = num_tiles * tb
    if b_pad != B:                                      # zero-pad ragged batch tail
        pad = ((0, 0), (0, b_pad - B), (0, 0))
        yp_t = jnp.pad(yp_t, pad)
        y_t = jnp.pad(y_t, pad)

    coord_spec = pl.BlockSpec((3, tb, N), lambda i: (0, i, 0))
    stats = pl.pallas_call(
        _stats_kernel,
        grid=(num_tiles,),
        in_specs=[coord_spec, coord_spec],
        out_specs=pl.BlockSpec((tb, 10), lambda i: (i, 0)),
        out_shape=jax.ShapeDtypeStruct((b_pad, 10), jnp.float32),
        compiler_params=pltpu.CompilerParams(
            dimension_semantics=("parallel",),
            vmem_limit_bytes=32 * 1024 * 1024),
    )(yp_t, y_t)

    stats = stats[:B]
    A = stats[:, :9].reshape(B, 3, 3)
    e0 = stats[:, 9]

    # Glue: batched 3x3 singular values + Biopython reflection sign fix.
    # ssq = E0 - 2*(s1 + s2 + sign(det A)*s3) == sum |yp @ rot + tran - y|^2.
    s = jnp.linalg.svd(A, compute_uv=False)             # descending, >= 0
    sign = jnp.where(jnp.linalg.det(A) < 0.0, -1.0, 1.0)
    sv_sum = s[:, 0] + s[:, 1] + sign * s[:, 2]
    ssq = jnp.maximum(e0 - 2.0 * sv_sum, 0.0)           # clamp rounding noise
    rms = jnp.sqrt(ssq / N)
    return jnp.mean(rms)


# ---------------------------------------------------------------------------
# Pure-JAX reference: the literal Biopython path (rotation applied) for checks.
# ---------------------------------------------------------------------------
def _rmsd_ref(y_prime, y):
    B, N, _ = y_prime.shape
    y_prime = y_prime.astype(jnp.float32)
    y = y.astype(jnp.float32)
    av1 = jnp.mean(y_prime, axis=1)
    av2 = jnp.mean(y, axis=1)
    yp_c = y_prime - av1[:, None, :]
    y_c = y - av2[:, None, :]
    A = jnp.einsum("bnd,bne->bde", yp_c, y_c)
    u, _, vt = jnp.linalg.svd(A)
    rot = jnp.matmul(u, vt)
    sign = jnp.where(jnp.linalg.det(rot) < 0.0, -1.0, 1.0)
    flip = jnp.stack([jnp.ones_like(sign), jnp.ones_like(sign), sign], axis=-1)
    rot = jnp.matmul(u, vt * flip[:, :, None])
    tran = av2 - jnp.einsum("bd,bde->be", av1, rot)
    transformed = jnp.einsum("bnd,bde->bne", y_prime, rot) + tran[:, None, :]
    rms = jnp.sqrt(jnp.sum((transformed - y) ** 2, axis=(1, 2)) / N)
    return jnp.mean(rms)


if __name__ == "__main__":
    key = jax.random.PRNGKey(0)
    k1, k2, k3, k4 = jax.random.split(key, 4)

    # Small case: single grid step (TB == batch).
    batch, n_atoms = 2, 16
    y = jax.random.normal(k1, (batch, n_atoms, 3), dtype=jnp.float32)
    y_prime = y + 0.1 * jax.random.normal(k2, (batch, n_atoms, 3), dtype=jnp.float32)
    loss = jax.block_until_ready(rmsd_loss_biopython(y_prime, y))
    ref = _rmsd_ref(y_prime, y)
    assert jnp.isfinite(loss), loss
    assert jnp.allclose(loss, ref, rtol=1e-3, atol=1e-3), (loss, ref)

    # Multi-tile case: grid > 1, ragged batch padded, coords far from origin
    # (exercises the in-kernel centering precision path).
    batch2, n_atoms2 = 20, 16
    y2 = 10.0 + jax.random.normal(k3, (batch2, n_atoms2, 3), dtype=jnp.float32)
    y2_prime = y2 + 0.1 * jax.random.normal(k4, (batch2, n_atoms2, 3), dtype=jnp.float32)
    loss2 = jax.block_until_ready(rmsd_loss_biopython(y2_prime, y2, batch_tile=8))
    ref2 = _rmsd_ref(y2_prime, y2)
    assert jnp.isfinite(loss2), loss2
    assert jnp.allclose(loss2, ref2, rtol=1e-3, atol=1e-3), (loss2, ref2)

    print("KERNEL_OK")
</pallas_src>

<mosaic_0001>
module attributes {stable_mosaic.version = 11 : i64} {
  func.func @_stats_kernel(%arg0: i32, %arg1: memref<3x2x16xf32, #tpu.memory_space<vmem>>, %arg2: memref<3x2x16xf32, #tpu.memory_space<vmem>>, %arg3: memref<2x10xf32, #tpu.memory_space<vmem>>) attributes {dimension_semantics = [#tpu.dimension_semantics<parallel>], iteration_bounds = array<i64: 1>, scalar_prefetch = 0 : i64, scratch_operands = 0 : i64, tpu.core_type = #tpu.core_type<tc>, window_params = [{transform_indices = @transform_0, window_bounds = array<i64: 3, 2, 16>}, {transform_indices = @transform_1, window_bounds = array<i64: 3, 2, 16>}, {transform_indices = @transform_2, window_bounds = array<i64: 2, 10>}]} {
    %c0 = arith.constant 0 : index
    %c0_0 = arith.constant 0 : index
    %c0_1 = arith.constant 0 : index
    %0 = vector.load %arg1[%c0, %c0_0, %c0_1] : memref<3x2x16xf32, #tpu.memory_space<vmem>>, vector<1x2x16xf32>
    %1 = vector.shape_cast %0 : vector<1x2x16xf32> to vector<2x16xf32>
    %c0_2 = arith.constant 0 : index
    %c0_3 = arith.constant 0 : index
    %c0_4 = arith.constant 0 : index
    %2 = vector.load %arg2[%c0_2, %c0_3, %c0_4] : memref<3x2x16xf32, #tpu.memory_space<vmem>>, vector<1x2x16xf32>
    %3 = vector.shape_cast %2 : vector<1x2x16xf32> to vector<2x16xf32>
    %cst = arith.constant dense<0.000000e+00> : vector<2xf32>
    %4 = vector.multi_reduction <add>, %1, %cst [1] : vector<2x16xf32> to vector<2xf32>
    %5 = vector.shape_cast %4 : vector<2xf32> to vector<2x1xf32>
    %cst_5 = arith.constant 6.250000e-02 : f32
    %6 = vector.broadcast %cst_5 : f32 to vector<2x1xf32>
    %7 = arith.mulf %5, %6 : vector<2x1xf32>
    %8 = vector.broadcast %7 : vector<2x1xf32> to vector<2x16xf32>
    %9 = arith.subf %1, %8 : vector<2x16xf32>
    %cst_6 = arith.constant dense<0.000000e+00> : vector<2xf32>
    %10 = vector.multi_reduction <add>, %3, %cst_6 [1] : vector<2x16xf32> to vector<2xf32>
    %11 = vector.shape_cast %10 : vector<2xf32> to vector<2x1xf32>
    %cst_7 = arith.constant 6.250000e-02 : f32
    %12 = vector.broadcast %cst_7 : f32 to vector<2x1xf32>
    %13 = arith.mulf %11, %12 : vector<2x1xf32>
    %14 = vector.broadcast %13 : vector<2x1xf32> to vector<2x16xf32>
    %15 = arith.subf %3, %14 : vector<2x16xf32>
    %c1 = arith.constant 1 : index
    %c0_8 = arith.constant 0 : index
    %c0_9 = arith.constant 0 : index
    %16 = vector.load %arg1[%c1, %c0_8, %c0_9] : memref<3x2x16xf32, #tpu.memory_space<vmem>>, vector<1x2x16xf32>
    %17 = vector.shape_cast %16 : vector<1x2x16xf32> to vector<2x16xf32>
    %c1_10 = arith.constant 1 : index
    %c0_11 = arith.constant 0 : index
    %c0_12 = arith.constant 0 : index
    %18 = vector.load %arg2[%c1_10, %c0_11, %c0_12] : memref<3x2x16xf32, #tpu.memory_space<vmem>>, vector<1x2x16xf32>
    %19 = vector.shape_cast %18 : vector<1x2x16xf32> to vector<2x16xf32>
    %cst_13 = arith.constant dense<0.000000e+00> : vector<2xf32>
    %20 = vector.multi_reduction <add>, %17, %cst_13 [1] : vector<2x16xf32> to vector<2xf32>
    %21 = vector.shape_cast %20 : vector<2xf32> to vector<2x1xf32>
    %cst_14 = arith.constant 6.250000e-02 : f32
    %22 = vector.broadcast %cst_14 : f32 to vector<2x1xf32>
    %23 = arith.mulf %21, %22 : vector<2x1xf32>
    %24 = vector.broadcast %23 : vector<2x1xf32> to vector<2x16xf32>
    %25 = arith.subf %17, %24 : vector<2x16xf32>
    %cst_15 = arith.constant dense<0.000000e+00> : vector<2xf32>
    %26 = vector.multi_reduction <add>, %19, %cst_15 [1] : vector<2x16xf32> to vector<2xf32>
    %27 = vector.shape_cast %26 : vector<2xf32> to vector<2x1xf32>
    %cst_16 = arith.constant 6.250000e-02 : f32
    %28 = vector.broadcast %cst_16 : f32 to vector<2x1xf32>
    %29 = arith.mulf %27, %28 : vector<2x1xf32>
    %30 = vector.broadcast %29 : vector<2x1xf32> to vector<2x16xf32>
    %31 = arith.subf %19, %30 : vector<2x16xf32>
    %c2 = arith.constant 2 : index
    %c0_17 = arith.constant 0 : index
    %c0_18 = arith.constant 0 : index
    %32 = vector.load %arg1[%c2, %c0_17, %c0_18] : memref<3x2x16xf32, #tpu.memory_space<vmem>>, vector<1x2x16xf32>
    %33 = vector.shape_cast %32 : vector<1x2x16xf32> to vector<2x16xf32>
    %c2_19 = arith.constant 2 : index
    %c0_20 = arith.constant 0 : index
    %c0_21 = arith.constant 0 : index
    %34 = vector.load %arg2[%c2_19, %c0_20, %c0_21] : memref<3x2x16xf32, #tpu.memory_space<vmem>>, vector<1x2x16xf32>
    %35 = vector.shape_cast %34 : vector<1x2x16xf32> to vector<2x16xf32>
    %cst_22 = arith.constant dense<0.000000e+00> : vector<2xf32>
    %36 = vector.multi_reduction <add>, %33, %cst_22 [1] : vector<2x16xf32> to vector<2xf32>
    %37 = vector.shape_cast %36 : vector<2xf32> to vector<2x1xf32>
    %cst_23 = arith.constant 6.250000e-02 : f32
    %38 = vector.broadcast %cst_23 : f32 to vector<2x1xf32>
    %39 = arith.mulf %37, %38 : vector<2x1xf32>
    %40 = vector.broadcast %39 : vector<2x1xf32> to vector<2x16xf32>
    %41 = arith.subf %33, %40 : vector<2x16xf32>
    %cst_24 = arith.constant dense<0.000000e+00> : vector<2xf32>
    %42 = vector.multi_reduction <add>, %35, %cst_24 [1] : vector<2x16xf32> to vector<2xf32>
    %43 = vector.shape_cast %42 : vector<2xf32> to vector<2x1xf32>
    %cst_25 = arith.constant 6.250000e-02 : f32
    %44 = vector.broadcast %cst_25 : f32 to vector<2x1xf32>
    %45 = arith.mulf %43, %44 : vector<2x1xf32>
    %46 = vector.broadcast %45 : vector<2x1xf32> to vector<2x16xf32>
    %47 = arith.subf %35, %46 : vector<2x16xf32>
    %48 = arith.mulf %9, %15 : vector<2x16xf32>
    %cst_26 = arith.constant dense<0.000000e+00> : vector<2xf32>
    %49 = vector.multi_reduction <add>, %48, %cst_26 [1] : vector<2x16xf32> to vector<2xf32>
    %50 = vector.shape_cast %49 : vector<2xf32> to vector<2x1xf32>
    %c0_27 = arith.constant 0 : index
    %c0_28 = arith.constant 0 : index
    %51 = vector.load %arg3[%c0_27, %c0_28] : memref<2x10xf32, #tpu.memory_space<vmem>>, vector<2x1xf32>
    tpu.vector_store %arg3[%c0_27, %c0_28], %50 {strides = array<i32>} : memref<2x10xf32, #tpu.memory_space<vmem>>, vector<2x1xf32>,
    %52 = arith.mulf %9, %31 : vector<2x16xf32>
    %cst_29 = arith.constant dense<0.000000e+00> : vector<2xf32>
    %53 = vector.multi_reduction <add>, %52, %cst_29 [1] : vector<2x16xf32> to vector<2xf32>
    %54 = vector.shape_cast %53 : vector<2xf32> to vector<2x1xf32>
    %c0_30 = arith.constant 0 : index
    %c1_31 = arith.constant 1 : index
    %55 = vector.load %arg3[%c0_30, %c1_31] : memref<2x10xf32, #tpu.memory_space<vmem>>, vector<2x1xf32>
    tpu.vector_store %arg3[%c0_30, %c1_31], %54 {strides = array<i32>} : memref<2x10xf32, #tpu.memory_space<vmem>>, vector<2x1xf32>,
    %56 = arith.mulf %9, %47 : vector<2x16xf32>
    %cst_32 = arith.constant dense<0.000000e+00> : vector<2xf32>
    %57 = vector.multi_reduction <add>, %56, %cst_32 [1] : vector<2x16xf32> to vector<2xf32>
    %58 = vector.shape_cast %57 : vector<2xf32> to vector<2x1xf32>
    %c0_33 = arith.constant 0 : index
    %c2_34 = arith.constant 2 : index
    %59 = vector.load %arg3[%c0_33, %c2_34] : memref<2x10xf32, #tpu.memory_space<vmem>>, vector<2x1xf32>
    tpu.vector_store %arg3[%c0_33, %c2_34], %58 {strides = array<i32>} : memref<2x10xf32, #tpu.memory_space<vmem>>, vector<2x1xf32>,
    %60 = arith.mulf %25, %15 : vector<2x16xf32>
    %cst_35 = arith.constant dense<0.000000e+00> : vector<2xf32>
    %61 = vector.multi_reduction <add>, %60, %cst_35 [1] : vector<2x16xf32> to vector<2xf32>
    %62 = vector.shape_cast %61 : vector<2xf32> to vector<2x1xf32>
    %c0_36 = arith.constant 0 : index
    %c3 = arith.constant 3 : index
    %63 = vector.load %arg3[%c0_36, %c3] : memref<2x10xf32, #tpu.memory_space<vmem>>, vector<2x1xf32>
    tpu.vector_store %arg3[%c0_36, %c3], %62 {strides = array<i32>} : memref<2x10xf32, #tpu.memory_space<vmem>>, vector<2x1xf32>,
    %64 = arith.mulf %25, %31 : vector<2x16xf32>
    %cst_37 = arith.constant dense<0.000000e+00> : vector<2xf32>
    %65 = vector.multi_reduction <add>, %64, %cst_37 [1] : vector<2x16xf32> to vector<2xf32>
    %66 = vector.shape_cast %65 : vector<2xf32> to vector<2x1xf32>
    %c0_38 = arith.constant 0 : index
    %c4 = arith.constant 4 : index
    %67 = vector.load %arg3[%c0_38, %c4] : memref<2x10xf32, #tpu.memory_space<vmem>>, vector<2x1xf32>
    tpu.vector_store %arg3[%c0_38, %c4], %66 {strides = array<i32>} : memref<2x10xf32, #tpu.memory_space<vmem>>, vector<2x1xf32>,
    %68 = arith.mulf %25, %47 : vector<2x16xf32>
    %cst_39 = arith.constant dense<0.000000e+00> : vector<2xf32>
    %69 = vector.multi_reduction <add>, %68, %cst_39 [1] : vector<2x16xf32> to vector<2xf32>
    %70 = vector.shape_cast %69 : vector<2xf32> to vector<2x1xf32>
    %c0_40 = arith.constant 0 : index
    %c5 = arith.constant 5 : index
    %71 = vector.load %arg3[%c0_40, %c5] : memref<2x10xf32, #tpu.memory_space<vmem>>, vector<2x1xf32>
    tpu.vector_store %arg3[%c0_40, %c5], %70 {strides = array<i32>} : memref<2x10xf32, #tpu.memory_space<vmem>>, vector<2x1xf32>,
    %72 = arith.mulf %41, %15 : vector<2x16xf32>
    %cst_41 = arith.constant dense<0.000000e+00> : vector<2xf32>
    %73 = vector.multi_reduction <add>, %72, %cst_41 [1] : vector<2x16xf32> to vector<2xf32>
    %74 = vector.shape_cast %73 : vector<2xf32> to vector<2x1xf32>
    %c0_42 = arith.constant 0 : index
    %c6 = arith.constant 6 : index
    %75 = vector.load %arg3[%c0_42, %c6] : memref<2x10xf32, #tpu.memory_space<vmem>>, vector<2x1xf32>
    tpu.vector_store %arg3[%c0_42, %c6], %74 {strides = array<i32>} : memref<2x10xf32, #tpu.memory_space<vmem>>, vector<2x1xf32>,
    %76 = arith.mulf %41, %31 : vector<2x16xf32>
    %cst_43 = arith.constant dense<0.000000e+00> : vector<2xf32>
    %77 = vector.multi_reduction <add>, %76, %cst_43 [1] : vector<2x16xf32> to vector<2xf32>
    %78 = vector.shape_cast %77 : vector<2xf32> to vector<2x1xf32>
    %c0_44 = arith.constant 0 : index
    %c7 = arith.constant 7 : index
    %79 = vector.load %arg3[%c0_44, %c7] : memref<2x10xf32, #tpu.memory_space<vmem>>, vector<2x1xf32>
    tpu.vector_store %arg3[%c0_44, %c7], %78 {strides = array<i32>} : memref<2x10xf32, #tpu.memory_space<vmem>>, vector<2x1xf32>,
    %80 = arith.mulf %41, %47 : vector<2x16xf32>
    %cst_45 = arith.constant dense<0.000000e+00> : vector<2xf32>
    %81 = vector.multi_reduction <add>, %80, %cst_45 [1] : vector<2x16xf32> to vector<2xf32>
    %82 = vector.shape_cast %81 : vector<2xf32> to vector<2x1xf32>
    %c0_46 = arith.constant 0 : index
    %c8 = arith.constant 8 : index
    %83 = vector.load %arg3[%c0_46, %c8] : memref<2x10xf32, #tpu.memory_space<vmem>>, vector<2x1xf32>
    tpu.vector_store %arg3[%c0_46, %c8], %82 {strides = array<i32>} : memref<2x10xf32, #tpu.memory_space<vmem>>, vector<2x1xf32>,
    %84 = arith.mulf %9, %9 : vector<2x16xf32>
    %85 = arith.mulf %15, %15 : vector<2x16xf32>
    %86 = arith.addf %84, %85 : vector<2x16xf32>
    %cst_47 = arith.constant dense<0.000000e+00> : vector<2xf32>
    %87 = vector.multi_reduction <add>, %86, %cst_47 [1] : vector<2x16xf32> to vector<2xf32>
    %88 = vector.shape_cast %87 : vector<2xf32> to vector<2x1xf32>
    %89 = arith.mulf %25, %25 : vector<2x16xf32>
    %90 = arith.mulf %31, %31 : vector<2x16xf32>
    %91 = arith.addf %89, %90 : vector<2x16xf32>
    %cst_48 = arith.constant dense<0.000000e+00> : vector<2xf32>
    %92 = vector.multi_reduction <add>, %91, %cst_48 [1] : vector<2x16xf32> to vector<2xf32>
    %93 = vector.shape_cast %92 : vector<2xf32> to vector<2x1xf32>
    %94 = arith.addf %88, %93 : vector<2x1xf32>
    %95 = arith.mulf %41, %41 : vector<2x16xf32>
    %96 = arith.mulf %47, %47 : vector<2x16xf32>
    %97 = arith.addf %95, %96 : vector<2x16xf32>
    %cst_49 = arith.constant dense<0.000000e+00> : vector<2xf32>
    %98 = vector.multi_reduction <add>, %97, %cst_49 [1] : vector<2x16xf32> to vector<2xf32>
    %99 = vector.shape_cast %98 : vector<2xf32> to vector<2x1xf32>
    %100 = arith.addf %94, %99 : vector<2x1xf32>
    %c0_50 = arith.constant 0 : index
    %c9 = arith.constant 9 : index
    %101 = vector.load %arg3[%c0_50, %c9] : memref<2x10xf32, #tpu.memory_space<vmem>>, vector<2x1xf32>
    tpu.vector_store %arg3[%c0_50, %c9], %100 {strides = array<i32>} : memref<2x10xf32, #tpu.memory_space<vmem>>, vector<2x1xf32>,
    return
  }
  func.func @transform_0(%arg0: i32) -> (i32, i32, i32) {
    %c0_i32 = arith.constant 0 : i32
    %c0_i32_0 = arith.constant 0 : i32
    %c0_i32_1 = arith.constant 0 : i32
    return %c0_i32, %arg0, %c0_i32_0 : i32, i32, i32
  }
  func.func @transform_1(%arg0: i32) -> (i32, i32, i32) {
    %c0_i32 = arith.constant 0 : i32
    %c0_i32_0 = arith.constant 0 : i32
    %c0_i32_1 = arith.constant 0 : i32
    return %c0_i32, %arg0, %c0_i32_0 : i32, i32, i32
  }
  func.func @transform_2(%arg0: i32) -> (i32, i32) {
    %c0_i32 = arith.constant 0 : i32
    %c0_i32_0 = arith.constant 0 : i32
    return %arg0, %c0_i32 : i32, i32
  }
}

</mosaic_0001>

<bundles_post_ra>
// kernel: custom-call.47
= control target key start
LH: loop header
LB: loop body
LE: loop exit
PB: predicated region body
PF: predicated region fallthrough
CT: control target
= control target key end

     0   :  { %s645_s9 = smov 0   ;;  %s647_s10 = smov 0   ;;  %s795_s0 = inlined_call_operand.vmem [shape: f32[2,6,3], index: 0, kind: input, shape index: {}]   ;;  %s796_s1 = inlined_call_operand.vmem [shape: f32[2,6,3], index: 1, kind: output, shape index: {0}]   ;;  %s797_s2 = inlined_call_operand.vmem [shape: f32[2,3], index: 2, kind: output, shape index: {1}]  }
   0x1   :  { %s649_s11 = smov 0   ;;  %s651_s12 = smov 0  }
   0x2   :  { %s653_s13 = smov 0  }
   0x3 LB: > { %s28_s14 = sadd.s32 1, %s618_s12  ;;  %s500_s15 = sadd.s32 4294967295, %s622_s13   ;;  %s622_s13 = sphi %s653_s13, %s9_s13   ;;  %s618_s12 = sphi %s651_s12, %s804_s12   ;;  %s614_s11 = sphi %s649_s11, %s803_s11   ;;  %s610_s10 = sphi %s647_s10, %s802_s10   ;;  %s606_s9 = sphi %s645_s9, %s801_s9  }
   0x4   : > { %p30_p0 = scmp.ge.s32.totalorder %s28_s14, 2  ;;  %s33_s16 = ssub.s32 0, %s618_s12 }
   0x5   : > { %s502_s17 = smin.u32 %s618_s12, %s33_s16  ;;  %p57_p1 = scmp.ne.s32.totalorder %s610_s10, %s606_s9 }
   0x6   : > { %s806_s14 = smov (%p30_p0, %s28_s14), 0  ;;  %s35_s18 = sshrl.u32 %s502_s17, 3 }
   0x7   : > { %s39_s19 = ssub.s32 0, %s806_s14  ;;  %p58_p2 = scmp.eq.s32.totalorder %s500_s15, 1 }
   0x8   : > { %s503_s20 = smin.u32 %s39_s19, %s806_s14  ;;  %s47_s24 = sadd.s32 1, %s610_s10 }
   0x9   : > { %s41_s21 = sshrl.u32 %s503_s20, 3  ;;  %p680_p3 = por %p58_p2, %p57_p1 }
   0xa   : > { %s44_s23 = ssub.s32 %s35_s18, %s41_s21  ;;  %p505_p5 = scmp.ge.s32.totalorder %s622_s13, 2 }
   0xb   : > { %p45_p4 = scmp.eq.s32.totalorder %s44_s23, 0  ;;  %s82_s26 = sand.u32 (!%p505_p5), 1, %s622_s13  }
   0xc   : > { %80 = sbr.rel (%p505_p5) target bundleno = 19 (0x13), region = 16  ;;  %s507_s27 = sshll.u32 (!%p505_p5), %s618_s12, 3 }
   0xd   : > { %s686_s25 = scalar_select %p45_p4, %s610_s10, %s47_s24  }
   0xe   : > { %s506_s28 = sshll.u32 (!%p505_p5), %s82_s26, 3  ;;  %s88_s3 = scalar_lea.vmem (!%p505_p5), %s795_s0, %s507_s27 }
   0xf   : > { %v116_v0 = vld [vmem:[%s88_s3] sm:$0xff] (!%p505_p5)  ;;  %s84_s4 = scalar_lea.vmem (!%p505_p5), [#allocation0], %s506_s28 }
  0x10   : > { %117 = vst [vmem:[%s84_s4] sm:$0xff] (!%p505_p5), %v116_v0 }
  0x13 PF: > { %p508_p6 = scmp.ge.s32.totalorder %s622_s13, 1  ;;  %p122_p7 = scmp.lt.s32.totalorder %s622_s13, 3 }
  0x15   : > { %p123_p8 = pnand %p508_p6, %p122_p7 }
  0x17   : > { %126 = sbr.rel (%p123_p8) target bundleno = 330 (0x14a), region = 54 }
  0x1e   : > { %s129_s5 = sand.u32 1, %s500_s15   ;;  %s143_s6 = sand.u32 1, %s606_s9   ;;  %v628_v2 = vmov 0.0  }
  0x1f   : > { %s509_s7 = sshll.u32 %s129_s5, 3  ;;  %s697_s8 = sshll.u32 %s143_s6, 1 }
  0x20   : > { %s152_s16 = sand.u32 7, %s614_s11   ;;  %s131_s17 = scalar_lea.vmem [#allocation0], %s509_s7 }
  0x21   : > { %v154_v1 = vld [vmem:[%s131_s17] sm:$0xff]  ;;  %s700_s18 = scalar_lea.vmem [#allocation1], %s509_s7  ;;  %s703_s19 = scalar_lea.vmem [#allocation2], %s152_s16 }
  0x22   : > { %155 = vst [vmem:[%s700_s18] sm:$0xff] %v154_v1  ;;  %156 = vst [vmem:[%s703_s19] sm:$0x1] %v628_v2  ;;  %s145_s15 = scalar_lea.vmem [#allocation3], %s697_s8  ;;  %s707_s20 = smov 0  }
  0x23 LB: >> { %v164_v3 = vlaneseq  ;;  %v716_v5 = vstv %s626_s20  ;;  %s191_s9 = scalar_lea.vmem %s700_s18, %s626_s20 [#allocation1]  ;;  %s249_s21 = scalar_lea.vmem [#allocation4], %s626_s20  ;;  %v629_v59 = vmov 1.0   ;;  %s626_s20 = sphi %s707_s20, %s162_s20  }
  0x24   : >> { %s266_s23 = smov [#allocation4] }
  0x25   : >> { %v713_v4 = vshrl.u32 %v164_v3, 7  ;;  %v243_v48 = vand.u32 127, %v164_v3 }
  0x27   : >> { %vm168_vm0 = vcmp.gt.s32.totalorder %v713_v4, %v716_v5  ;;  %vm169_vm1 = vcmp.lt.s32.totalorder %v713_v4, 6  ;;  %v230_v4 = vmov %v713_v4  ;;  %vm734_vm12 = vcmp.eq.s32.totalorder %v243_v48, %v716_v5 }
  0x28   : >> { %vm170_vm2 = vmand %vm168_vm0, %vm169_vm1  ;;  %vm234_vm9 = vcmp.gt.s32.totalorder %v230_v4, %v716_v5  ;;  %vm235_vm10 = vcmp.lt.s32.totalorder %v230_v4, 6  ;;  %v269_v4 = vmov %v713_v4  ;;  %vm295_vm15 = vcmp.gt.s32.totalorder %v243_v48, %v716_v5 }
  0x29   : >> { %v163_v6 = vld [vmem:[%s700_s18] sm:$0xff]  ;;  %v192_v15 = vld [vmem:[%s191_s9] ss:$0 sm:$0xff]  ;;  %s227_s18 = smov %s700_s18  ;;  %vm236_vm11 = vmand %vm234_vm9, %vm235_vm10  ;;  %vm274_vm13 = vcmp.lt.s32.totalorder %v269_v4, 6  ;;  %v286_v4 = vmov %v713_v4 }
  0x2a   : >> { %v171_v7 = vsel %vm170_vm2, %v163_v6, 0.0  ;;  %v193_v16 = vand.u32 2147483647, %v192_v15  ;;  %vm218_vm8 = vcmp.lt.f32.partialorder %v192_v15, 0.0  ;;  %v231_v45 = vld [vmem:[%s227_s18] sm:$0xff]  ;;  %s265_s18 = smov %s700_s18  ;;  %vm303_vm14 = vcmp.ge.s32.totalorder %v286_v4, %v716_v5 }
  0x2b   : >> { %v172_v8 = vmul.f32 %v171_v7, %v171_v7  ;;  %v237_v49 = vsel %vm236_vm11, %v231_v45, 0.0  ;;  %v262_v60 = vld [vmem:[%s703_s19] ss:$0 sm:$0xff]  ;;  %vm304_vm0 = vmand %vm734_vm12, %vm303_vm14 }
  0x2c   : >> { %v194_v21 = vmax.f32 %v193_v16, 0.0  ;;  %v272_v63 = vld [vmem:[%s265_s18] sm:$0xff]  ;;  %s282_s18 = smov %s265_s18 }
  0x2d   : >> { %v173_v9 = vrot.slane %v172_v8, 4  ;;  %s307_s24 = scalar_lea.vmem %s282_s18, %s626_s20  ;;  %s162_s20 = sadd.s32 1, %s626_s20  }
  0x2e   : >> { %p159_p9 = scmp.ge.s32.totalorder %s162_s20, 3  }
  0x2f   : >> { %v174_v10 = vadd.f32 %v173_v9, %v172_v8  ;;  %s515_s26 = sshll.u32 (%p159_p9), %s614_s11, 3 }
  0x30   : > { %s332_s29 = scalar_lea.vmem (%p159_p9), %s796_s1, %s515_s26 }
  0x31   : >> { %v175_v11 = vrot.slane %v174_v10, 2 }
  0x33   : >> { %v176_v12 = vadd.f32 %v175_v11, %v174_v10 }
  0x35   : >> { %v177_v13 = vrot.slane %v176_v12, 1 }
  0x37   : >> { %v178_v14 = vadd.f32 %v177_v13, %v176_v12  ;;  %v293_v13 = vld [vmem:[%s282_s18] sm:$0xff] }
  0x39   : >> { %570 = vrsqrt.f32 %v178_v14  ;;  %vm181_vm3 = vcmp.eq.f32.partialorder %v178_v14, inf  ;;  %v184_v18 = vand.u32 2147483648, %v178_v14  ;;  %vm183_vm4 = vcmp.eq.f32.partialorder %v178_v14, 0.0 }
  0x43   : >> { %v571_v17 = vpop.eup %570 }
  0x44   : >> { %v180_v19 = vmul.f32 %v571_v17, %v178_v14 }
  0x46   : >> { %v182_v20 = vsel %vm181_vm3, %v178_v14, %v180_v19 }
  0x47   : >> { %v185_v22 = vsel %vm183_vm4, %v184_v18, %v182_v20 }
  0x48   : >> { %v195_v23 = vand.u32 2147483647, %v185_v22 }
  0x4a   : >> { %v196_v24 = vmax.f32 %v194_v21, %v195_v23 }
  0x4c   : >> { %572 = vrcp.f32 %v196_v24  ;;  %vm208_vm7 = vcmp.eq.f32.partialorder %v196_v24, 0.0 }
  0x56   : >> { %v573_v25 = vpop.eup %572 }
  0x57   : >> { %v198_v26 = vmul.f32 %v573_v25, %v193_v16  ;;  %v201_v27 = vmul.f32 0.0, %v573_v25  ;;  %v205_v28 = vmul.f32 %v573_v25, %v195_v23 }
  0x59   : >> { %v199_v29 = vmul.f32 %v198_v26, %v198_v26  ;;  %v202_v30 = vmul.f32 %v201_v27, %v201_v27  ;;  %v206_v31 = vmul.f32 %v205_v28, %v205_v28 }
  0x5b   : >> { %v203_v32 = vadd.f32 %v202_v30, %v199_v29 }
  0x5d   : >> { %v207_v33 = vadd.f32 %v206_v31, %v203_v32 }
  0x5f   : >> { %574 = vrsqrt.f32 %v207_v33  ;;  %vm211_vm5 = vcmp.eq.f32.partialorder %v207_v33, inf  ;;  %v214_v35 = vand.u32 2147483648, %v207_v33  ;;  %vm213_vm6 = vcmp.eq.f32.partialorder %v207_v33, 0.0 }
  0x69   : >> { %v575_v34 = vpop.eup %574 }
  0x6a   : >> { %v210_v36 = vmul.f32 %v575_v34, %v207_v33 }
  0x6c   : >> { %v212_v37 = vsel %vm211_vm5, %v207_v33, %v210_v36 }
  0x6d   : >> { %v215_v38 = vsel %vm213_vm6, %v214_v35, %v212_v37 }
  0x6e   : >> { %v216_v39 = vmul.f32 %v215_v38, %v196_v24 }
  0x70   : >> { %v217_v40 = vsel %vm208_vm7, 0.0, %v216_v39 }
  0x71   : >> { %v219_v41 = vxor.u32 2147483648, %v217_v40 }
  0x73   : >> { %v220_v42 = vsel %vm218_vm8, %v217_v40, %v219_v41 }
  0x74   : >> { %v726_v43 = vsel %vm183_vm4, %v192_v15, %v220_v42  ;;  %576 = vrcp.f32 %v220_v42  ;;  %v221_v46 = vsub.f32 %v220_v42, %v192_v15 }
  0x75   : >> { %v226_v44 = vsub.f32 %v192_v15, %v726_v43 }
  0x77   : >> { %578 = vrcp.f32 %v226_v44 }
  0x7e   : >> { %v577_v47 = vpop.eup %576 }
  0x7f   : >> { %v223_v50 = vmul.f32 %v577_v47, %v221_v46 }
  0x81   : >> { %v579_v51 = vpop.eup %578  ;;  %v225_v55 = vsel %vm183_vm4, 0.0, %v223_v50 }
  0x82   : >> { %v239_v52 = vmul.f32 %v579_v51, %v237_v49  ;;  %v255_v57 = vsel %vm734_vm12, %v225_v55, 0.0 }
  0x84   : >> { %v240_v54 = vsel %vm183_vm4, 0.0, %v239_v52 }
  0x85   : >> { %v245_v56 = vsel %vm734_vm12, %v240_v54, 0.0 }
  0x86   : >> { %246 = vadd.xlane.f32.xlu0 %v245_v56 }
  0x8a   : >> { %256 = vadd.xlane.f32.xlu0 %v255_v57 }
 0x113   : >> { %v247_v58 = vpop.xlane.xlu0 %246 }
 0x114   : >> { %248 = vst [vmem:[#allocation4] sm:$0xff] %v247_v58 }
 0x115   : >> { %250 = vst [vmem:[%s249_s21] sm:$0x1] %v629_v59 }
 0x117   : >> { %v257_v61 = vpop.xlane.xlu0 %256 }
 0x118   : >> { %v263_v62 = vsel %vm734_vm12, %v257_v61, %v262_v60 }
 0x119   : >> { %264 = vst [vmem:[%s703_s19] sm:$0x1] %v263_v62 }
 0x11c   : >> { %v271_v0 = vld [vmem:[%s266_s23] sm:$0xff]  ;;  %s283_s23 = smov %s266_s23 }
 0x11d   : >> { %v273_v1 = vmul.f32 %v272_v63, %v271_v0  ;;  %v291_v12 = vld [vmem:[%s283_s23] sm:$0xff] }
 0x11f   : >> { %v275_v2 = vsel %vm274_vm13, %v273_v1, 0.0 }
 0x120   : >> { %v276_v3 = vrot.slane %v275_v2, 4  ;;  %v318_v4 = vld [vmem:[#allocation2] sm:$0x3] (%p159_p9) }
 0x121   : > { %320 = vst [vmem:[%s145_s15] sm:$0x3] (%p159_p9), %v318_v4 }
 0x122   : >> { %v277_v6 = vadd.f32 %v276_v3, %v275_v2 }
 0x124   : >> { %v278_v7 = vrot.slane %v277_v6, 2 }
 0x126   : >> { %v279_v8 = vadd.f32 %v278_v7, %v277_v6 }
 0x128   : >> { %v280_v9 = vrot.slane %v279_v8, 1 }
 0x12a   : >> { %v281_v10 = vadd.f32 %v280_v9, %v279_v8 }
 0x12c   : >> { %v287_v11 = vmul.f32 %v281_v10, %v257_v61 }
 0x12e   : >> { %v292_v14 = vmul.f32 %v291_v12, %v287_v11 }
 0x130   : >> { %v296_v15 = vsub.f32 %v293_v13, %v292_v14 }
 0x132   : >> { %v297_v16 = vsel %vm295_vm15, %v296_v15, %v293_v13 }
 0x133   : >> { %v305_v17 = vsel %vm304_vm0, %v291_v12, %v297_v16 }
 0x134   : >> { %306 = vst [vmem:[%s282_s18] sm:$0xff] %v305_v17 }
 0x137   : > { %161 = sbr.rel (!%p159_p9) target bundleno = 35 (0x23), region = 175 }
 0x13b   : >> { %v308_v18 = vld [vmem:[%s307_s24] ss:$0 sm:$0xff] }
 0x13c   : >> { %v313_v19 = vsel %vm734_vm12, %v726_v43, %v308_v18 }
 0x13d   : >> { %314 = vst [vmem:[%s307_s24] sm:$0x1] %v313_v19 }
 0x13e   : > { %p368_p10 = scmp.lt.s32.totalorder (%p680_p3), %s614_s11, 0  ;;  %s369_s30 = ssub.s32 (%p680_p3), 0, %s614_s11  ;;  %v391_v20 = vld [vmem:[%s145_s15] sm:$0x3] (%p680_p3) }
 0x13f   : > { %367 = sbr.rel (!%p680_p3) target bundleno = 330 (0x14a), region = 99  ;;  %s516_s3 = smin.u32 (%p680_p3), %s614_s11, %s369_s30 }
 0x140   : > { %s371_s4 = sshrl.u32 (%p680_p3), %s516_s3, 3 }
 0x141   : > { %s372_s5 = ssub.s32 (%p680_p3), 0, %s371_s4 }
 0x144   : > { %v360_v5 = vld [vmem:[%s700_s18] sm:$0xff] }
 0x145   : > { %361 = vst [vmem:[%s332_s29] sm:$0xff] %v360_v5 }
 0x146   : > { %s808_s5 = smov (!%p368_p10, %s372_s5), %s371_s4 }
 0x147   : > { %s517_s6 = sshll.u32 %s808_s5, 1 }
 0x148   : > { %s375_s17 = scalar_lea.vmem %s797_s2, %s517_s6 }
 0x149   : > { %392 = vst [vmem:[%s375_s17] sm:$0x3] %v391_v20 }
 0x14a PF: > { %s9_s13 = sadd.s32 1, %s622_s13   ;;  %s801_s9 = smov %s610_s10 }
 0x14b   : > { %p6_p11 = scmp.ge.s32.totalorder %s9_s13, 4   ;;  %s802_s10 = smov %s686_s25 }
 0x14c   : > { %s803_s11 = smov %s618_s12  ;;  %s804_s12 = smov %s806_s14 }
 0x14d   :  { %8 = sbr.rel (!%p6_p11) target bundleno = 3 (0x3), region = 186 }

// kernel: custom-call.48
= control target key start
LH: loop header
LB: loop body
LE: loop exit
PB: predicated region body
PF: predicated region fallthrough
CT: control target
= control target key end

     0   :  { %s236_s6 = smov 0   ;;  %s263_s0 = inlined_call_operand.vmem [shape: f32[2,3,3], index: 0, kind: input, shape index: {}]   ;;  %s264_s1 = inlined_call_operand.vmem [shape: f32[2,3,3], index: 1, kind: output, shape index: {}]  }
   0x1 LB: > { %s198_s7 = sadd.s32 4294967295, %s224_s6   ;;  %p200_p0 = scmp.ge.s32.totalorder %s224_s6, 2  ;;  %s224_s6 = sphi %s236_s6, %s7_s6  }
   0x2   : > { %s23_s8 = sand.u32 (!%p200_p0), 1, %s224_s6   ;;  %s202_s9 = sshll.u32 (!%p200_p0), %s224_s6, 2 }
   0x3   : > { %21 = sbr.rel (%p200_p0) target bundleno = 10 (0xa), region = 16  ;;  %s201_s10 = sshll.u32 (!%p200_p0), %s23_s8, 2 }
   0x4   : > { %s27_s13 = scalar_lea.vmem (!%p200_p0), %s263_s0, %s202_s9  ;;  %s25_s14 = scalar_lea.vmem (!%p200_p0), [#allocation1], %s201_s10 }
   0x5   : > { %v43_v0 = vld [vmem:[%s27_s13] sm:$0xf] (!%p200_p0) }
   0x6   : > { %44 = vst [vmem:[%s25_s14] sm:$0xf] (!%p200_p0), %v43_v0 }
   0xa PF: > { %p203_p1 = scmp.ge.s32.totalorder %s224_s6, 1  ;;  %p60_p2 = scmp.lt.s32.totalorder %s224_s6, 3 }
   0xc   : > { %p61_p3 = pnand %p203_p1, %p60_p2 }
   0xd   : > { %s252_s15 = sand.u32 (!%p61_p3), 1, %s198_s7   ;;  %v82_v1 = vlaneseq (!%p61_p3)  ;;  %vm96_vm1 = vcmask (!%p61_p3), 23552   ;;  %s207_s19 = sshll.u32 (!%p61_p3), %s198_s7, 2 }
   0xe   : > { %64 = sbr.rel (%p61_p3) target bundleno = 334 (0x14e), region = 50  ;;  %s204_s16 = sshll.u32 (!%p61_p3), %s252_s15, 2 }
   0xf   : > { %s73_s17 = scalar_lea.vmem (!%p61_p3), [#allocation1], %s204_s16  ;;  %v83_v3 = vand.u32 (!%p61_p3), 127, %v82_v1  ;;  %v85_v4 = vshrl.u32 (!%p61_p3), %v82_v1, 7  ;;  %s77_s18 = scalar_lea.vmem (!%p61_p3), [#allocation3], %s204_s16 }
  0x10   : > { %v80_v2 = vld [vmem:[%s73_s17] sm:$0xf] (!%p61_p3)  ;;  %s128_s22 = scalar_lea.vmem (!%p61_p3), %s264_s1, %s207_s19 }
  0x11   : > { %81 = vst [vmem:[#allocation0] sm:$0xf] (!%p61_p3), %v80_v2  ;;  %vm91_vm0 = vcmp.eq.s32.totalorder (!%p61_p3), %v83_v3, 0  ;;  %vm87_vm2 = vcmp.eq.s32.totalorder (!%p61_p3), %v83_v3, %v85_v4  ;;  %vm100_vm3 = vcmp.eq.s32.totalorder (!%p61_p3), %v83_v3, 1  ;;  %vm111_vm4 = vcmp.eq.s32.totalorder (!%p61_p3), %v83_v3, 2 }
  0x18   : > { %v88_v5 = vld [vmem:[#allocation0] sm:$0xff] }
  0x19   : > { %v95_v6 = vld [vmem:[#allocation0 + $0x1] ss:$0 sm:$0xff]  ;;  %v92_v7 = vsel %vm91_vm0, %v88_v5, 1.0  ;;  %v106_v11 = vld [vmem:[#allocation0 + $0x2] ss:$0 sm:$0xff] }
  0x1a   : > { %v97_v8 = vsel %vm96_vm1, %v95_v6, 0.0  ;;  %v93_v9 = vsel %vm87_vm2, %v92_v7, 0.0  ;;  %v108_v12 = vsel %vm96_vm1, %v106_v11, 0.0 }
  0x1b   : > { %v101_v10 = vmul.f32 %v97_v8, %v93_v9 }
  0x1d   : > { %102 = vadd.xlane.f32.xlu0 %v101_v10 }
  0xaa   : > { %v103_v13 = vpop.xlane.xlu0 %102 }
  0xab   : > { %v104_v14 = vsel %vm100_vm3, %v103_v13, %v93_v9 }
  0xac   : > { %v112_v15 = vmul.f32 %v108_v12, %v104_v14 }
  0xae   : > { %113 = vadd.xlane.f32.xlu0 %v112_v15 }
 0x13b   : > { %v114_v16 = vpop.xlane.xlu0 %113 }
 0x13c   : > { %v115_v17 = vsel %vm111_vm4, %v114_v16, %v104_v14 }
 0x13d   : > { %116 = vst [vmem:[#allocation2] sm:$0xff] %v115_v17 }
 0x144   : > { %v120_v18 = vld [vmem:[#allocation2] sm:$0xf] }
 0x145   : > { %122 = vst [vmem:[%s77_s18] sm:$0xf] %v120_v18 }
 0x14c   : > { %v144_v19 = vld [vmem:[%s77_s18] sm:$0xf] }
 0x14d   : > { %145 = vst [vmem:[%s128_s22] sm:$0xf] %v144_v19 }
 0x14e PF: > { %s7_s6 = sadd.s32 1, %s224_s6  }
 0x14f   : > { %p4_p4 = scmp.ge.s32.totalorder %s7_s6, 4  }
 0x151   :  { %6 = sbr.rel (!%p4_p4) target bundleno = 1 (0x1), region = 112 }

// kernel: custom-call.40
= control target key start
LH: loop header
LB: loop body
LE: loop exit
PB: predicated region body
PF: predicated region fallthrough
CT: control target
= control target key end

     0   :  { %s6_s0 = inlined_call_operand.hbm [shape: pred[2], index: 0, kind: output, shape index: {}]  }

// kernel: rmsd_loss_biopython.1
= control target key start
LH: loop header
LB: loop body
LE: loop exit
PB: predicated region body
PF: predicated region fallthrough
CT: control target
= control target key end

     0   :  { %7 = vsyncpa [#allocation3], 0  ;;  %s176_s9 = smov [#allocation2]   ;;  %s263_s0 = inlined_call_operand.vmem [shape: f32[3,2,16], index: 0, kind: input, shape index: {}]   ;;  %s264_s1 = inlined_call_operand.hbm [shape: f32[3,2,16], index: 1, kind: input, shape index: {}]   ;;  %s265_s2 = inlined_call_operand.vmem [shape: f32[2,10], index: 2, kind: output, shape index: {}]  }
   0x1   :  { %s15_s10 = sshll.u32 %s176_s9, 4  ;;  %s152_s13 = scalar_lea.hbm %s264_s1, 96  ;;  %s16_s10 = int_to_ptr.vmem [resolvable:$true] %s15_s10 }
   0x2   :  { %p153_p0 = scmp.ne.s32.totalorder %s264_s1, %s152_s13  ;;  %p156_p1 = scmp.lt.u32.totalorder %s152_s13, %s264_s1 }
   0x4   :  { %p158_p2 = pnand %p156_p1, %p153_p0 }
   0x6   :  { %161 = shalt.err (!%p158_p2)
}
   0x7   :  { %s162_s18 = scalar_lea.vmem %s16_s10, 96  ;;  %p167_p4 = scmp.lt.s32.totalorder %s16_s10, %s16_s10 }
   0x8   :  { %p163_p3 = scmp.ne.s32.totalorder %s16_s10, %s162_s18  ;;  %p168_p5 = scmp.lt.s32.totalorder %s162_s18, %s162_s18 }
   0xa   :  { %p169_p6 = por %p168_p5, %p167_p4 }
   0xc   :  { %p170_p7 = pnand %p169_p6, %p163_p3 }
   0xe   :  { %173 = shalt.err (!%p170_p7)
}
   0xf   :  { %s177_s19 = smov 32   ;;  %s178_s20 = smov 2  }
  0x10   :  { %21 = dma.hbm_to_vmem [thread:$0]  %s264_s1, 96, %s16_s10, [#allocation3], %s177_s19, %s177_s19, %s178_s20  }
  0x11   :  { %174 = dma.done.wait [#allocation3], 96  }
  0x12   :  { %175 = vsyncadd [#allocation3], 4294967200  ;;  %vm27_vm0 = vcmask 123904   ;;  %v41_v0 = vld [vmem:[#allocation2 + $0x2] sm:$0x3]  ;;  %vm70_vm1 = vcmask 1024  }
  0x13   :  { %v25_v1 = vld [vmem:[%s263_s0] sm:$0x3]  ;;  %v55_v2 = vld [vmem:[#allocation2 + $0x4] sm:$0x3]  ;;  %v47_v3 = vsel %vm27_vm0, %v41_v0, 0.0  ;;  %vm76_vm2 = vcmask 9224  }
  0x14   :  { %v28_v4 = vsel %vm27_vm0, %v25_v1, 0.0  ;;  %v26_v5 = vld [vmem:[#allocation2] sm:$0x3]  ;;  %48 = vadd.xlane.f32.xlu1 %v47_v3  ;;  %v61_v6 = vsel %vm27_vm0, %v55_v2, 0.0  ;;  %v148_v8 = vld [vmem:[%s263_s0 + $0x4] sm:$0x3] }
  0x15   :  { %29 = vadd.xlane.f32.xlu0 %v28_v4  ;;  %v33_v7 = vsel %vm27_vm0, %v26_v5, 0.0  ;;  %v147_v9 = vld [vmem:[%s263_s0 + $0x2] sm:$0x3]  ;;  %v56_v10 = vsel %vm27_vm0, %v148_v8, 0.0  ;;  %vm82_vm3 = vcmask 17424   ;;  %vm88_vm4 = vcmask 25624  }
  0x16   :  { %v42_v11 = vsel %vm27_vm0, %v147_v9, 0.0  ;;  %vm94_vm5 = vcmask 33824   ;;  %vm100_vm6 = vcmask 42024   ;;  %vm106_vm7 = vcmask 50224  }
  0x17   :  { %vm112_vm8 = vcmask 58424   ;;  %vm118_vm9 = vcmask 66624   ;;  %vm140_vm10 = vcmask 74824  }
  0x18   :  { %62 = vadd.xlane.f32.xlu1 %v61_v6 }
  0x19   :  { %34 = vadd.xlane.f32.xlu0 %v33_v7 }
  0x1c   :  { %57 = vadd.xlane.f32.xlu1 %v56_v10 }
  0x1d   :  { %43 = vadd.xlane.f32.xlu0 %v42_v11 }
  0xa1   :  { %v49_v12 = vpop.xlane.xlu1 %48 }
  0xa2   :  { %v30_v13 = vpop.xlane.xlu0 %29  ;;  %v50_v14 = vmul.f32 0.0625, %v49_v12 }
  0xa3   :  { %v31_v15 = vmul.f32 0.0625, %v30_v13 }
  0xa4   :  { %v51_v16 = vsub.f32 %v41_v0, %v50_v14 }
  0xa5   :  { %v32_v17 = vsub.f32 %v25_v1, %v31_v15  ;;  %v63_v18 = vpop.xlane.xlu1 %62 }
  0xa6   :  { %v35_v19 = vpop.xlane.xlu0 %34  ;;  %v64_v20 = vmul.f32 0.0625, %v63_v18  ;;  %v127_v47 = vmul.f32 %v51_v16, %v51_v16 }
  0xa7   :  { %v36_v21 = vmul.f32 0.0625, %v35_v19  ;;  %v72_v22 = vmul.f32 %v51_v16, %v32_v17  ;;  %v120_v46 = vmul.f32 %v32_v17, %v32_v17 }
  0xa8   :  { %v65_v23 = vsub.f32 %v55_v2, %v64_v20 }
  0xa9   :  { %v37_v24 = vsub.f32 %v26_v5, %v36_v21  ;;  %v73_v25 = vsel %vm27_vm0, %v72_v22, 0.0  ;;  %v58_v26 = vpop.xlane.xlu1 %57 }
  0xaa   :  { %74 = vadd.xlane.f32.xlu1 %v73_v25  ;;  %v44_v27 = vpop.xlane.xlu0 %43  ;;  %v59_v30 = vmul.f32 0.0625, %v58_v26  ;;  %v78_v33 = vmul.f32 %v65_v23, %v32_v17  ;;  %v134_v49 = vmul.f32 %v65_v23, %v65_v23 }
  0xab   :  { %v45_v28 = vmul.f32 0.0625, %v44_v27  ;;  %v66_v29 = vmul.f32 %v37_v24, %v32_v17  ;;  %v121_v41 = vmul.f32 %v37_v24, %v37_v24 }
  0xac   :  { %v60_v35 = vsub.f32 %v148_v8, %v59_v30  ;;  %v79_v36 = vsel %vm27_vm0, %v78_v33, 0.0 }
  0xad   :  { %v46_v31 = vsub.f32 %v147_v9, %v45_v28  ;;  %v67_v32 = vsel %vm27_vm0, %v66_v29, 0.0  ;;  %v122_v48 = vadd.f32 %v121_v41, %v120_v46 }
  0xae   :  { %68 = vadd.xlane.f32.xlu0 %v67_v32  ;;  %v102_v40 = vmul.f32 %v60_v35, %v37_v24  ;;  %v108_v44 = vmul.f32 %v60_v35, %v51_v16  ;;  %v133_v53 = vmul.f32 %v60_v35, %v60_v35  ;;  %v114_v57 = vmul.f32 %v65_v23, %v60_v35 }
  0xaf   :  { %v84_v34 = vmul.f32 %v46_v31, %v37_v24  ;;  %v90_v38 = vmul.f32 %v51_v16, %v46_v31  ;;  %v96_v39 = vmul.f32 %v65_v23, %v46_v31  ;;  %v126_v45 = vmul.f32 %v46_v31, %v46_v31 }
  0xb0   :  { %v103_v50 = vsel %vm27_vm0, %v102_v40, 0.0  ;;  %v109_v51 = vsel %vm27_vm0, %v108_v44, 0.0  ;;  %v123_v54 = vsel %vm27_vm0, %v122_v48, 0.0  ;;  %v135_v56 = vadd.f32 %v134_v49, %v133_v53 }
  0xb1   :  { %v85_v37 = vsel %vm27_vm0, %v84_v34, 0.0  ;;  %v91_v42 = vsel %vm27_vm0, %v90_v38, 0.0  ;;  %v97_v43 = vsel %vm27_vm0, %v96_v39, 0.0  ;;  %v128_v52 = vadd.f32 %v127_v47, %v126_v45 }
  0xb2   :  { %80 = vadd.xlane.f32.xlu0 %v79_v36  ;;  %86 = vadd.xlane.f32.xlu1 %v85_v37  ;;  %v136_v58 = vsel %vm27_vm0, %v135_v56, 0.0  ;;  %v115_v59 = vsel %vm27_vm0, %v114_v57, 0.0 }
  0xb3   :  { %v129_v55 = vsel %vm27_vm0, %v128_v52, 0.0 }
  0xb6   :  { %92 = vadd.xlane.f32.xlu0 %v91_v42  ;;  %98 = vadd.xlane.f32.xlu1 %v97_v43 }
  0xba   :  { %104 = vadd.xlane.f32.xlu0 %v103_v50  ;;  %110 = vadd.xlane.f32.xlu1 %v109_v51 }
  0xbe   :  { %124 = vadd.xlane.f32.xlu0 %v123_v54  ;;  %130 = vadd.xlane.f32.xlu1 %v129_v55 }
  0xc2   :  { %137 = vadd.xlane.f32.xlu0 %v136_v58  ;;  %116 = vadd.xlane.f32.xlu1 %v115_v59 }
 0x137   :  { %v75_v60 = vpop.xlane.xlu1 %74 }
 0x13b   :  { %v69_v61 = vpop.xlane.xlu0 %68 }
 0x13c   :  { %71 = vst.msk [vmem:[%s265_s2] sm:$0x3] %vm70_vm1, %v69_v61 }
 0x13d   :  { %77 = vst.msk [vmem:[%s265_s2] sm:$0x3] %vm76_vm2, %v75_v60 }
 0x13f   :  { %v87_v62 = vpop.xlane.xlu1 %86  ;;  %v81_v63 = vpop.xlane.xlu0 %80 }
 0x140   :  { %83 = vst.msk [vmem:[%s265_s2] sm:$0x3] %vm82_vm3, %v81_v63 }
 0x141   :  { %89 = vst.msk [vmem:[%s265_s2] sm:$0x3] %vm88_vm4, %v87_v62 }
 0x143   :  { %v99_v0 = vpop.xlane.xlu1 %98  ;;  %v93_v1 = vpop.xlane.xlu0 %92 }
 0x144   :  { %95 = vst.msk [vmem:[%s265_s2] sm:$0x3] %vm94_vm5, %v93_v1 }
 0x145   :  { %101 = vst.msk [vmem:[%s265_s2] sm:$0x3] %vm100_vm6, %v99_v0 }
 0x147   :  { %v111_v2 = vpop.xlane.xlu1 %110  ;;  %v105_v3 = vpop.xlane.xlu0 %104 }
 0x148   :  { %107 = vst.msk [vmem:[%s265_s2] sm:$0x3] %vm106_vm7, %v105_v3 }
 0x149   :  { %113 = vst.msk [vmem:[%s265_s2] sm:$0x3] %vm112_vm8, %v111_v2 }
 0x14b   :  { %v131_v4 = vpop.xlane.xlu1 %130  ;;  %v125_v5 = vpop.xlane.xlu0 %124 }
 0x14c   :  { %v132_v6 = vadd.f32 %v131_v4, %v125_v5 }
 0x14f   :  { %v117_v7 = vpop.xlane.xlu1 %116  ;;  %v138_v8 = vpop.xlane.xlu0 %137 }
 0x150   :  { %119 = vst.msk [vmem:[%s265_s2] sm:$0x3] %vm118_vm9, %v117_v7  ;;  %v139_v9 = vadd.f32 %v138_v8, %v132_v6 }
 0x152   :  { %141 = vst.msk [vmem:[%s265_s2] sm:$0x3] %vm140_vm10, %v139_v9 }
 0x153   :  { %146 = vsyncpa [#allocation3], 1 }

// kernel: custom-call.45
= control target key start
LH: loop header
LB: loop body
LE: loop exit
PB: predicated region body
PF: predicated region fallthrough
CT: control target
= control target key end

     0   :  { %s343_s6 = smov 0   ;;  %s345_s7 = smov 0   ;;  %s390_s0 = inlined_call_operand.vmem [shape: f32[2,3,3], index: 0, kind: input, shape index: {}]   ;;  %s391_s1 = inlined_call_operand.vmem [shape: f32[2,3,3], index: 1, kind: output, shape index: {}]  }
   0x1   :  { %s347_s8 = smov 0  }
   0x2 LB: > { %s265_s9 = sadd.s32 4294967295, %s330_s8   ;;  %s26_s10 = sadd.s32 1, %s326_s7  ;;  %s330_s8 = sphi %s347_s8, %s7_s8   ;;  %s326_s7 = sphi %s345_s7, %s393_s7   ;;  %s322_s6 = sphi %s343_s6, %s392_s6  }
   0x3   : > { %p28_p0 = scmp.ge.s32.totalorder %s26_s10, 2  ;;  %p267_p1 = scmp.ge.s32.totalorder %s330_s8, 2 }
   0x4   : > { %s42_s11 = sand.u32 (!%p267_p1), 1, %s330_s8   ;;  %s269_s12 = sshll.u32 (!%p267_p1), %s326_s7, 2 }
   0x5   : > { %s395_s10 = smov (%p28_p0, %s26_s10), 0  ;;  %40 = sbr.rel (%p267_p1) target bundleno = 12 (0xc), region = 16 }
   0x6   : > { %s268_s13 = sshll.u32 (!%p267_p1), %s42_s11, 2  ;;  %s48_s16 = scalar_lea.vmem (!%p267_p1), %s390_s0, %s269_s12 }
   0x7   : > { %v64_v0 = vld [vmem:[%s48_s16] sm:$0xf] (!%p267_p1)  ;;  %s44_s17 = scalar_lea.vmem (!%p267_p1), [#allocation1], %s268_s13 }
   0x8   : > { %65 = vst [vmem:[%s44_s17] sm:$0xf] (!%p267_p1), %v64_v0 }
   0xc PF: > { %p270_p2 = scmp.ge.s32.totalorder %s330_s8, 1  ;;  %p81_p3 = scmp.lt.s32.totalorder %s330_s8, 3 }
   0xe   : > { %p82_p4 = pnand %p270_p2, %p81_p3 }
   0xf   : > { %v332_v1 = vmov (!%p82_p4), 0.0   ;;  %s370_s18 = sand.u32 (!%p82_p4), 1, %s265_s9   ;;  %vm104_vm0 = vcmask (!%p82_p4), 7168   ;;  %vm122_vm1 = vcmask (!%p82_p4), 15368   ;;  %vm139_vm2 = vcmask (!%p82_p4), 1047553   ;;  %s274_s22 = sshll.u32 (!%p82_p4), %s322_s6, 2 }
  0x10   : > { %85 = sbr.rel (%p82_p4) target bundleno = 541 (0x21d), region = 50  ;;  %103 = vst [vmem:[#allocation2] sm:$0xff] (!%p82_p4), %v332_v1  ;;  %s271_s19 = sshll.u32 (!%p82_p4), %s370_s18, 2  ;;  %vm140_vm3 = vmand (!%p82_p4), %vm122_vm1, %vm139_vm2  ;;  %vm144_vm4 = vcmask (!%p82_p4), 23568   ;;  %vm161_vm5 = vcmask (!%p82_p4), 1047554  }
  0x11   : > { %s94_s20 = scalar_lea.vmem (!%p82_p4), [#allocation1], %s271_s19  ;;  %vm162_vm6 = vmand (!%p82_p4), %vm144_vm4, %vm161_vm5  ;;  %s98_s21 = scalar_lea.vmem (!%p82_p4), [#allocation3], %s271_s19 }
  0x12   : > { %v101_v5 = vld [vmem:[%s94_s20] sm:$0xf] (!%p82_p4)  ;;  %s179_s25 = scalar_lea.vmem (!%p82_p4), %s391_s1, %s274_s22 }
  0x13   : > { %102 = vst [vmem:[#allocation0] sm:$0xf] (!%p82_p4), %v101_v5 }
  0x17   : > { %v105_v2 = vld [vmem:[#allocation2] ss:$0 sm:$0xff] }
  0x18   : > { %v107_v3 = vmul.f32 %v105_v2, %v105_v2  ;;  %v114_v4 = vmul.f32 0.0, %v105_v2 }
  0x1a   : > { %108 = vadd.xlane.f32.xlu0 %v107_v3  ;;  %v106_v6 = vld [vmem:[#allocation0] ss:$0 sm:$0xff]  ;;  %v126_v18 = vld [vmem:[#allocation0 + $0x1] ss:$0 sm:$0xff]  ;;  %v148_v30 = vld [vmem:[#allocation0 + $0x2] ss:$0 sm:$0xff] }
  0x1b   : > { %v112_v10 = vld [vmem:[#allocation0] sm:$0xff] }
  0x1e   : > { %115 = vadd.xlane.f32.xlu0 %v114_v4 }
  0xa7   : > { %v109_v7 = vpop.xlane.xlu0 %108 }
  0xa8   : > { %v110_v8 = vsub.f32 %v106_v6, %v109_v7 }
  0xaa   : > { %302 = vrsqrt.f32 %v110_v8 }
  0xab   : > { %v116_v9 = vpop.xlane.xlu0 %115 }
  0xac   : > { %v117_v11 = vsub.f32 %v112_v10, %v116_v9 }
  0xb4   : > { %v303_v12 = vpop.eup %302 }
  0xb5   : > { %v118_v13 = vmul.f32 %v303_v12, %v117_v11 }
  0xb7   : > { %v119_v14 = vsel %vm104_vm0, %v118_v13, 0.0 }
  0xb8   : > { %121 = vst [vmem:[#allocation2] sm:$0xff] %v119_v14 }
  0xbf   : > { %v124_v15 = vld [vmem:[#allocation2 + $0x1] ss:$0 sm:$0xff] }
  0xc0   : > { %v127_v16 = vmul.f32 %v124_v15, %v124_v15  ;;  %v134_v17 = vmul.f32 %v124_v15, %v119_v14 }
  0xc2   : > { %128 = vadd.xlane.f32.xlu1 %v127_v16 }
  0xc6   : > { %135 = vadd.xlane.f32.xlu1 %v134_v17 }
 0x14f   : > { %v129_v19 = vpop.xlane.xlu1 %128 }
 0x150   : > { %v130_v20 = vsub.f32 %v126_v18, %v129_v19 }
 0x152   : > { %304 = vrsqrt.f32 %v130_v20 }
 0x153   : > { %v136_v21 = vpop.xlane.xlu1 %135 }
 0x154   : > { %v137_v22 = vsub.f32 %v112_v10, %v136_v21 }
 0x15c   : > { %v305_v23 = vpop.eup %304 }
 0x15d   : > { %v138_v24 = vmul.f32 %v305_v23, %v137_v22 }
 0x15f   : > { %v141_v25 = vsel %vm140_vm3, %v138_v24, 0.0 }
 0x160   : > { %v142_v26 = vadd.f32 %v141_v25, %v119_v14 }
 0x162   : > { %143 = vst [vmem:[#allocation2] sm:$0xff] %v142_v26 }
 0x169   : > { %v146_v27 = vld [vmem:[#allocation2 + $0x2] ss:$0 sm:$0xff] }
 0x16a   : > { %v156_v28 = vmul.f32 %v146_v27, %v142_v26  ;;  %v149_v29 = vmul.f32 %v146_v27, %v146_v27 }
 0x16c   : > { %157 = vadd.xlane.f32.xlu1 %v156_v28  ;;  %150 = vadd.xlane.f32.xlu0 %v149_v29 }
 0x1f9   : > { %v151_v31 = vpop.xlane.xlu0 %150  ;;  %v158_v33 = vpop.xlane.xlu1 %157 }
 0x1fa   : > { %v152_v32 = vsub.f32 %v148_v30, %v151_v31  ;;  %v159_v34 = vsub.f32 %v112_v10, %v158_v33 }
 0x1fc   : > { %306 = vrsqrt.f32 %v152_v32 }
 0x206   : > { %v307_v35 = vpop.eup %306 }
 0x207   : > { %v160_v36 = vmul.f32 %v307_v35, %v159_v34 }
 0x209   : > { %v163_v37 = vsel %vm162_vm6, %v160_v36, 0.0 }
 0x20a   : > { %v164_v38 = vadd.f32 %v163_v37, %v142_v26 }
 0x20c   : > { %165 = vst [vmem:[#allocation2] sm:$0xff] %v164_v38 }
 0x213   : > { %v169_v39 = vld [vmem:[#allocation2] sm:$0xf] }
 0x214   : > { %171 = vst [vmem:[%s98_s21] sm:$0xf] %v169_v39 }
 0x21b   : > { %v195_v40 = vld [vmem:[%s98_s21] sm:$0xf] }
 0x21c   : > { %196 = vst [vmem:[%s179_s25] sm:$0xf] %v195_v40 }
 0x21d PF: > { %s7_s8 = sadd.s32 1, %s330_s8   ;;  %s392_s6 = smov %s326_s7 }
 0x21e   : > { %p4_p5 = scmp.ge.s32.totalorder %s7_s8, 4   ;;  %s393_s7 = smov %s395_s10 }
 0x220   :  { %6 = sbr.rel (!%p4_p5) target bundleno = 2 (0x2), region = 114 }

// kernel: custom-call.46
= control target key start
LH: loop header
LB: loop body
LE: loop exit
PB: predicated region body
PF: predicated region fallthrough
CT: control target
= control target key end

     0   :  { %s343_s6 = smov 0   ;;  %s345_s7 = smov 0   ;;  %s390_s0 = inlined_call_operand.vmem [shape: f32[2,1,3,3], index: 0, kind: input, shape index: {}]   ;;  %s391_s1 = inlined_call_operand.vmem [shape: f32[2,1,3,3], index: 1, kind: output, shape index: {}]  }
   0x1   :  { %s347_s8 = smov 0  }
   0x2 LB: > { %s269_s9 = sadd.s32 4294967295, %s330_s8   ;;  %s33_s10 = sadd.s32 1, %s326_s7  ;;  %s330_s8 = sphi %s347_s8, %s7_s8   ;;  %s326_s7 = sphi %s345_s7, %s393_s7   ;;  %s322_s6 = sphi %s343_s6, %s392_s6  }
   0x3   : > { %p35_p0 = scmp.ge.s32.totalorder %s33_s10, 2  ;;  %p271_p1 = scmp.ge.s32.totalorder %s330_s8, 2 }
   0x4   : > { %s49_s11 = sand.u32 (!%p271_p1), 1, %s330_s8   ;;  %s273_s12 = sshll.u32 (!%p271_p1), %s326_s7, 2 }
   0x5   : > { %s395_s10 = smov (%p35_p0, %s33_s10), 0  ;;  %47 = sbr.rel (%p271_p1) target bundleno = 12 (0xc), region = 16 }
   0x6   : > { %s272_s13 = sshll.u32 (!%p271_p1), %s49_s11, 2  ;;  %s56_s16 = scalar_lea.vmem (!%p271_p1), %s390_s0, %s273_s12 }
   0x7   : > { %v72_v0 = vld [vmem:[%s56_s16] sm:$0xf] (!%p271_p1)  ;;  %s51_s17 = scalar_lea.vmem (!%p271_p1), [#allocation1], %s272_s13 }
   0x8   : > { %73 = vst [vmem:[%s51_s17] sm:$0xf] (!%p271_p1), %v72_v0 }
   0xc PF: > { %p274_p2 = scmp.ge.s32.totalorder %s330_s8, 1  ;;  %p89_p3 = scmp.lt.s32.totalorder %s330_s8, 3 }
   0xe   : > { %p90_p4 = pnand %p274_p2, %p89_p3 }
  0x10   : > { %93 = sbr.rel (%p90_p4) target bundleno = 511 (0x1ff), region = 50 }
  0x17   : > { %s370_s18 = sand.u32 1, %s269_s9   ;;  %v111_v1 = vlaneseq  ;;  %v332_v11 = vmov -1.0   ;;  %s278_s22 = sshll.u32 %s322_s6, 2 }
  0x18   : > { %s275_s19 = sshll.u32 %s370_s18, 2  ;;  %s178_s25 = scalar_lea.vmem %s391_s1, %s278_s22 }
  0x19   : > { %s102_s20 = scalar_lea.vmem [#allocation1], %s275_s19  ;;  %v112_v3 = vand.u32 127, %v111_v1  ;;  %v115_v4 = vshrl.u32 %v111_v1, 7  ;;  %s106_s21 = scalar_lea.vmem [#allocation3], %s275_s19 }
  0x1a   : > { %v109_v2 = vld [vmem:[%s102_s20] sm:$0xf] }
  0x1b   : > { %110 = vst [vmem:[#allocation0] sm:$0xf] %v109_v2  ;;  %vm113_vm0 = vcmp.lt.s32.totalorder %v112_v3, 3  ;;  %vm122_vm1 = vcmp.ge.s32.totalorder %v115_v4, %v112_v3  ;;  %vm117_vm2 = vcmp.eq.s32.totalorder %v115_v4, %v112_v3  ;;  %vm136_vm4 = vcmp.eq.s32.totalorder %v112_v3, 0 }
  0x1c   : > { %vm123_vm3 = vmand %vm122_vm1, %vm113_vm0  ;;  %vm133_vm5 = vcmp.eq.s32.totalorder %v112_v3, %v115_v4  ;;  %v137_v12 = vsel %vm136_vm4, 1.0, %v332_v11  ;;  %vm144_vm6 = vcmp.eq.s32.totalorder %v112_v3, 1  ;;  %vm154_vm7 = vcmp.eq.s32.totalorder %v112_v3, 2 }
  0x1d   : > { %v138_v13 = vsel %vm133_vm5, %v137_v12, 0.0 }
  0x22   : > { %v118_v5 = vld [vmem:[#allocation0] sm:$0xff] }
  0x23   : > { %v119_v6 = vsel %vm117_vm2, %v118_v5, 0.0  ;;  %v124_v7 = vsel %vm123_vm3, %v118_v5, 0.0 }
  0x24   : > { %120 = vadd.xlane.f32.xlu0 %v119_v6 }
  0xb1   : > { %v121_v8 = vpop.xlane.xlu0 %120 }
  0xb2   : > { %306 = vrcp.f32 %v121_v8  ;;  %vm161_vm8 = vweird.f32 %v121_v8 }
  0xbc   : > { %v307_v9 = vpop.eup %306 }
  0xbd   : > { %v126_v10 = vmul.f32 %v307_v9, %v124_v7 }
  0xbf   : > { %127 = vst [vmem:[#allocation4] sm:$0xff] %v126_v10 }
  0xc6   : > { %v140_v14 = vld [vmem:[#allocation4 + $0x1] ss:$0 sm:$0xff]  ;;  %v150_v17 = vld [vmem:[#allocation4 + $0x2] ss:$0 sm:$0xff] }
  0xc7   : > { %v141_v15 = vxor.u32 2147483648, %v140_v14  ;;  %v151_v19 = vxor.u32 2147483648, %v150_v17 }
  0xc9   : > { %v145_v16 = vmul.f32 %v141_v15, %v138_v13 }
  0xcb   : > { %146 = vadd.xlane.f32.xlu0 %v145_v16 }
 0x158   : > { %v147_v18 = vpop.xlane.xlu0 %146 }
 0x159   : > { %v148_v20 = vsel %vm144_vm6, %v147_v18, %v138_v13 }
 0x15a   : > { %v155_v21 = vmul.f32 %v151_v19, %v148_v20 }
 0x15c   : > { %156 = vadd.xlane.f32.xlu1 %v155_v21 }
 0x1e9   : > { %v157_v22 = vpop.xlane.xlu1 %156 }
 0x1ea   : > { %v158_v23 = vsel %vm154_vm7, %v157_v22, %v148_v20 }
 0x1eb   : > { %v160_v24 = vmul.f32 %v307_v9, %v158_v23 }
 0x1ed   : > { %v162_v25 = vsel %vm161_vm8, %v158_v23, %v160_v24 }
 0x1ee   : > { %163 = vst [vmem:[#allocation2] sm:$0xff] %v162_v25 }
 0x1f5   : > { %v167_v26 = vld [vmem:[#allocation2] sm:$0xf] }
 0x1f6   : > { %169 = vst [vmem:[%s106_s21] sm:$0xf] %v167_v26 }
 0x1fd   : > { %v194_v27 = vld [vmem:[%s106_s21] sm:$0xf] }
 0x1fe   : > { %195 = vst [vmem:[%s178_s25] sm:$0xf] %v194_v27 }
 0x1ff PF: > { %s7_s8 = sadd.s32 1, %s330_s8   ;;  %s392_s6 = smov %s326_s7 }
 0x200   : > { %p4_p5 = scmp.ge.s32.totalorder %s7_s8, 4   ;;  %s393_s7 = smov %s395_s10 }
 0x202   :  { %6 = sbr.rel (!%p4_p5) target bundleno = 2 (0x2), region = 112 }

// kernel: custom-call.16
= control target key start
LH: loop header
LB: loop body
LE: loop exit
PB: predicated region body
PF: predicated region fallthrough
CT: control target
= control target key end

     0   :  { %s2160_s0 = inlined_call_operand.vmem [shape: f32[2,2,2], index: 0, kind: input, shape index: {}]   ;;  %s2161_s1 = inlined_call_operand.vmem [shape: f32[2,2,2], index: 1, kind: input, shape index: {}]   ;;  %s2162_s2 = inlined_call_operand.vmem [shape: f32[2,2,2], index: 2, kind: input, shape index: {}]   ;;  %s2163_s3 = inlined_call_operand.vmem [shape: f32[2,2,2], index: 3, kind: input, shape index: {}]   ;;  %s2164_s4 = inlined_call_operand.vmem [shape: f32[2,2], index: 4, kind: output, shape index: {0}]   ;;  %s2165_s5 = inlined_call_operand.vmem [shape: f32[2,2], index: 5, kind: output, shape index: {1}]   ;;  %s2166_s6 = inlined_call_operand.hbm [shape: f32[2,2,2], index: 6, kind: output, shape index: {2}]   ;;  %s2167_s7 = inlined_call_operand.hbm [shape: f32[2,2,2], index: 7, kind: output, shape index: {3}]   ;;  %s2168_s8 = inlined_call_operand.hbm [shape: f32[2,2,2], index: 8, kind: output, shape index: {4}]   ;;  %s2169_s9 = inlined_call_operand.hbm [shape: f32[2,2,2], index: 9, kind: output, shape index: {5}]  }
   0x1   :  { %2170 = sst [smem:[#allocation40_spill]] %s2160_s0 }
   0x2   :  { %2171 = sst [smem:[#allocation41_spill]] %s2161_s1 }
   0x3   :  { %11 = vsyncpa [#allocation14], 0 }
   0x4   :  { %13 = vsyncpa [#allocation14 + $0x1], 0 }
   0x5   :  { %14 = vsyncpa [#allocation17], 0 }
   0x6   :  { %16 = vsyncpa [#allocation17 + $0x1], 0 }
   0x7   :  { %17 = vsyncpa [#allocation22], 0 }
   0x8   :  { %19 = vsyncpa [#allocation22 + $0x1], 0  ;;  %s1759_s30 = smov 0   ;;  %s1761_s10 = smov 0  }
   0x9   :  { %s1763_s11 = smov 0  }
   0xa LB: > { %s1775_s12 = sadd.s32 4294967295, %s1692_s11   ;;  %s1779_s14 = sadd.s32 1, %s1692_s11   ;;  %s1692_s11 = sphi %s1763_s11, %s2193_s11   ;;  %s1688_s10 = sphi %s1761_s10, %s2192_s10   ;;  %s1684_s30 = sphi %s1759_s30, %s2191_s30  }
   0xb   : > { %s29_s15 = sshrl.u32 %s1692_s11, 3  ;;  %s30_s16 = sshrl.u32 %s1779_s14, 3 }
   0xc   : > { %s34_s17 = sadd.s32 1, %s1688_s10  ;;  %s31_s18 = ssub.s32 %s29_s15, %s30_s16 }
   0xd   : > { %p44_p0 = scmp.ne.s32.totalorder %s1688_s10, %s1684_s30  ;;  %p32_p1 = scmp.eq.s32.totalorder %s31_s18, 0 }
   0xe   : > { %p45_p2 = scmp.eq.s32.totalorder %s1775_s12, 1  ;;  %p1440_p4 = scmp.ge.s32.totalorder %s1692_s11, 2 }
   0xf   : > { %s1788_s19 = scalar_select %p32_p1, %s1688_s10, %s34_s17  }
  0x10   : > { %p1790_p3 = por %p45_p2, %p44_p0  ;;  %95 = sbr.rel (%p1440_p4) target bundleno = 29 (0x1d), region = 16 }
  0x11   : > { %2172 = sst [smem:[#allocation39_spill]] %s1788_s19  ;;  %s97_s21 = sand.u32 (!%p1440_p4), 1, %s1692_s11  }
  0x12   : > { %s1442_s22 = sshll.u32 (!%p1440_p4), %s1692_s11, 1  ;;  %s1441_s23 = sshll.u32 (!%p1440_p4), %s97_s21, 1 }
  0x13   : > { %s2174_s0 = sld [smem:[#allocation40_spill]] (!%p1440_p4)  ;;  %s99_s27 = scalar_lea.vmem (!%p1440_p4), [#allocation1], %s1441_s23 }
  0x14   : > { %s2175_s1 = sld [smem:[#allocation41_spill]] (!%p1440_p4)  ;;  %s175_s18 = scalar_lea.vmem (!%p1440_p4), %s2162_s2, %s1442_s22 }
  0x15   : > { %s136_s13 = scalar_lea.vmem (!%p1440_p4), [#allocation3], %s1441_s23  ;;  %v191_v2 = vld [vmem:[%s175_s18] sm:$0x3] (!%p1440_p4)  ;;  %s212_s24 = scalar_lea.vmem (!%p1440_p4), %s2163_s3, %s1442_s22 }
  0x16   : > { %s173_s25 = scalar_lea.vmem (!%p1440_p4), [#allocation5], %s1441_s23  ;;  %v228_v3 = vld [vmem:[%s212_s24] sm:$0x3] (!%p1440_p4) }
  0x17   : > { %192 = vst [vmem:[%s173_s25] sm:$0x3] %v191_v2 }
  0x19   : > { %s101_s26 = scalar_lea.vmem %s2174_s0, %s1442_s22 }
  0x1a   : > { %v117_v0 = vld [vmem:[%s101_s26] sm:$0x3]  ;;  %s138_s15 = scalar_lea.vmem %s2175_s1, %s1442_s22  ;;  %s210_s26 = scalar_lea.vmem [#allocation7], %s1441_s23 }
  0x1b   : > { %118 = vst [vmem:[%s99_s27] sm:$0x3] %v117_v0  ;;  %v154_v1 = vld [vmem:[%s138_s15] sm:$0x3]  ;;  %229 = vst [vmem:[%s210_s26] sm:$0x3] %v228_v3 }
  0x1c   : > { %155 = vst [vmem:[%s136_s13] sm:$0x3] %v154_v1 }
  0x1d PF: > { %p1449_p5 = scmp.ge.s32.totalorder %s1692_s11, 1  ;;  %p245_p6 = scmp.lt.s32.totalorder %s1692_s11, 3 }
  0x1f   : > { %p246_p7 = pnand %p1449_p5, %p245_p6 }
  0x21   : > { %249 = sbr.rel (%p246_p7) target bundleno = 1100 (0x44c), region = 140 }
  0x28   : > { %s1814_s13 = sand.u32 1, %s1775_s12   ;;  %s286_s27 = sand.u32 1, %s1684_s30   ;;  %v350_v4 = vlaneseq  ;;  %v1702_v5 = vmov 0.0  }
  0x29   : > { %s1818_s19 = sshll.u32 %s1814_s13, 1  ;;  %s1820_s22 = sshll.u32 %s286_s27, 1  ;;  %345 = vst [vmem:[#allocation12] sm:$0xff] %v1702_v5  ;;  %346 = vst [vmem:[#allocation15] sm:$0xff] %v1702_v5 }
  0x2a   : > { %347 = vst [vmem:[#allocation18] sm:$0xff] %v1702_v5  ;;  %348 = vst [vmem:[#allocation20] sm:$0xff] %v1702_v5  ;;  %v1822_v6 = vand.u32 127, %v350_v4  ;;  %v1824_v7 = vshrl.u32 %v350_v4, 7  ;;  %s270_s23 = scalar_lea.vmem [#allocation1], %s1818_s19  ;;  %s274_s30 = scalar_lea.vmem [#allocation3], %s1818_s19 }
  0x2b   : > { %v317_v8 = vld [vmem:[%s270_s23] sm:$0x3]  ;;  %v321_v9 = vld [vmem:[%s274_s30] sm:$0x3]  ;;  %s278_s28 = scalar_lea.vmem [#allocation5], %s1818_s19  ;;  %s282_s29 = scalar_lea.vmem [#allocation7], %s1818_s19 }
  0x2c   : > { %318 = vst [vmem:[#allocation0] sm:$0x3] %v317_v8  ;;  %322 = vst [vmem:[#allocation2] sm:$0x3] %v321_v9  ;;  %v325_v10 = vld [vmem:[%s278_s28] sm:$0x3]  ;;  %v352_v6 = vmov %v1822_v6  ;;  %v355_v7 = vmov %v1824_v7 }
  0x2d   : > { %v329_v11 = vld [vmem:[%s282_s29] sm:$0x3]  ;;  %326 = vst [vmem:[#allocation4] sm:$0x3] %v325_v10  ;;  %v365_v6 = vmov %v1822_v6  ;;  %v368_v7 = vmov %v1824_v7  ;;  %s333_s15 = smov [#allocation23]  ;;  %s336_s16 = smov [#allocation24]  ;;  %vm359_vm0 = vcmp.eq.s32.totalorder %v355_v7, %v352_v6 }
  0x2e   : > { %330 = vst [vmem:[#allocation6] sm:$0x3] %v329_v11  ;;  %vm372_vm1 = vcmp.eq.s32.totalorder %v368_v7, %v365_v6  ;;  %s349_s17 = smov [#allocation12]  ;;  %s362_s18 = smov [#allocation20]  ;;  %vm1329_vm2 = vcmp.lt.s32.totalorder %v1822_v6, 2  ;;  %v1321_v6 = vmov %v1822_v6  ;;  %v1324_v7 = vmov %v1824_v7 }
  0x2f   : > { %s339_s21 = smov [#allocation25]  ;;  %s342_s24 = smov [#allocation26]  ;;  %vm1334_vm3 = vcmp.eq.s32.totalorder %v1324_v7, %v1321_v6  ;;  %v1372_v6 = vmov %v1822_v6  ;;  %v1341_v7 = vmov %v1824_v7 }
  0x30   : > { %v356_v12 = vld [vmem:[%s349_s17] sm:$0x3]  ;;  %s1325_s29 = smov [#allocation23]  ;;  %s1342_s0 = smov [#allocation24]  ;;  %v1338_v6 = vmov %v1822_v6  ;;  %v1375_v7 = vmov %v1824_v7 }
  0x31   : > { %v369_v13 = vld [vmem:[%s362_s18] sm:$0x3]  ;;  %v360_v16 = vsel %vm359_vm0, 1.0, %v356_v12  ;;  %v1355_v6 = vmov %v1822_v6  ;;  %v1358_v7 = vmov %v1824_v7  ;;  %vm1385_vm4 = vcmp.eq.s32.totalorder %v1375_v7, %v1372_v6 }
  0x32   : > { %v373_v17 = vsel %vm372_vm1, 1.0, %v369_v13  ;;  %361 = vst [vmem:[%s349_s17] sm:$0x3] %v360_v16 }
  0x33   : > { %v334_v14 = vld [vmem:[#allocation0] sm:$0xff]  ;;  %v337_v15 = vld [vmem:[#allocation2] sm:$0xff]  ;;  %374 = vst [vmem:[%s362_s18] sm:$0x3] %v373_v17 }
  0x34   : > { %335 = vst [vmem:[%s333_s15] sm:$0xff] %v334_v14  ;;  %338 = vst [vmem:[%s336_s16] sm:$0xff] %v337_v15  ;;  %v340_v18 = vld [vmem:[#allocation4] sm:$0xff]  ;;  %s1359_s15 = smov [#allocation25]  ;;  %s1376_s16 = smov [#allocation26] }
  0x35   : > { %v343_v19 = vld [vmem:[#allocation6] sm:$0xff]  ;;  %341 = vst [vmem:[%s339_s21] sm:$0xff] %v340_v18 }
  0x36   : > { %344 = vst [vmem:[%s342_s24] sm:$0xff] %v343_v19 }
  0x3b   : > { %v1331_v20 = vld [vmem:[%s1325_s29] sm:$0x3] }
  0x3c   : > { %v1348_v21 = vld [vmem:[%s1342_s0] sm:$0x3]  ;;  %v1332_v22 = vsel %vm1329_vm2, %v1331_v20, 0.0 }
  0x3d   : > { %v1349_v23 = vsel %vm1329_vm2, %v1348_v21, 0.0  ;;  %v1365_v24 = vld [vmem:[%s1359_s15] sm:$0x3]  ;;  %v1333_v26 = vmul.f32 %v1332_v22, %v1332_v22 }
  0x3e   : > { %v1382_v25 = vld [vmem:[%s1376_s16] sm:$0x3]  ;;  %v1350_v27 = vmul.f32 %v1349_v23, %v1349_v23  ;;  %v1366_v28 = vsel %vm1329_vm2, %v1365_v24, 0.0 }
  0x3f   : > { %v1383_v29 = vsel %vm1329_vm2, %v1382_v25, 0.0  ;;  %v1367_v30 = vmul.f32 %v1366_v28, %v1366_v28  ;;  %v1335_v33 = vsel %vm1334_vm3, 0.0, %v1333_v26 }
  0x40   : > { %v1352_v31 = vadd.f32 %v1350_v27, %v1333_v26  ;;  %v1384_v32 = vmul.f32 %v1383_v29, %v1383_v29  ;;  %v1351_v34 = vadd.f32 %v1350_v27, %v1335_v33 }
  0x42   : > { %v1369_v35 = vadd.f32 %v1367_v30, %v1352_v31  ;;  %v1368_v36 = vadd.f32 %v1367_v30, %v1351_v34  ;;  %v1386_v37 = vsel %vm1385_vm4, 0.0, %v1384_v32 }
  0x44   : > { %v1388_v38 = vadd.f32 %v1384_v32, %v1369_v35  ;;  %v1387_v39 = vadd.f32 %v1386_v37, %v1368_v36 }
  0x46   : > { %1389 = vadd.xlane.f32.xlu0 %v1388_v38 }
  0x4a   : > { %1397 = vadd.xlane.f32.xlu0 %v1387_v39 }
  0xd3   : > { %v1390_v40 = vpop.xlane.xlu0 %1389 }
  0xd4   : > { %v1391_v41 = vrot.slane %v1390_v40, 4 }
  0xd6   : > { %v1392_v42 = vadd.f32 %v1391_v41, %v1390_v40 }
  0xd7   : > { %v1398_v43 = vpop.xlane.xlu0 %1397 }
  0xd8   : > { %v1393_v44 = vrot.slane %v1392_v42, 2  ;;  %v1399_v45 = vrot.slane %v1398_v43, 4 }
  0xda   : > { %v1400_v46 = vadd.f32 %v1399_v45, %v1398_v43  ;;  %v1394_v47 = vadd.f32 %v1393_v44, %v1392_v42 }
  0xdc   : > { %v1401_v48 = vrot.slane %v1400_v46, 2  ;;  %v1395_v50 = vrot.slane %v1394_v47, 1 }
  0xde   : > { %v1402_v49 = vadd.f32 %v1401_v48, %v1400_v46  ;;  %v1396_v53 = vadd.f32 %v1395_v50, %v1394_v47 }
  0xe0   : > { %v1403_v51 = vrot.slane %v1402_v49, 1 }
  0xe2   : > { %v1404_v52 = vadd.f32 %v1403_v51, %v1402_v49 }
  0xe4   : > { %1490 = vpush %v1404_v52 }
  0xe5   : > { %1492 = vpush %v1396_v53 }
 0x115   : > { %s1491_s0 = spop %1490 }
 0x116   : > { %s1493_s17 = spop %1492 }
 0x117   : > { %s1407_s18 = smul.f32 1e-10, %s1493_s17 }
 0x119   : > { %p1408_p8 = scmp.le.f32.partialorder %s1491_s0, %s1407_s18 }
 0x11a   : > { %s1858_s21 = smov (!%p1408_p8), 0  }
 0x11b   : > { %1411 = sbr.rel (%p1408_p8) target bundleno = 965 (0x3c5), region = 349 }
 0x122 LB: >> { %s1863_s24 = smov 0   ;;  %s1696_s21 = sphi %s1858_s21, %s2176_s21  }
 0x123 LB: >>> { %s479_s29 = smov [#allocation23]  ;;  %v483_v6 = vmov %v1822_v6  ;;  %v486_v7 = vmov %v1824_v7  ;;  %s499_s15 = smov [#allocation24]  ;;  %vm802_vm14 = vcmp.eq.s32.totalorder %v1824_v7, 0  ;;  %vm814_vm15 = vcmp.eq.s32.totalorder %v1824_v7, 1  ;;  %s1700_s24 = sphi %s1863_s24, %s478_s24  }
 0x124   : >>> { %v503_v6 = vmov %v1822_v6  ;;  %v506_v7 = vmov %v1824_v7  ;;  %v487_v54 = vld [vmem:[%s479_s29] sm:$0x3]  ;;  %vm490_vm5 = vcmp.eq.s32.totalorder %v486_v7, %v483_v6  ;;  %s519_s16 = smov [#allocation26]  ;;  %s480_s0 = smov [#allocation27] }
 0x125   : >>> { %vm510_vm6 = vcmp.eq.s32.totalorder %v506_v7, %v503_v6  ;;  %v523_v6 = vmov %v1822_v6  ;;  %v526_v7 = vmov %v1824_v7  ;;  %v491_v55 = vsel %vm490_vm5, %v487_v54, 0.0  ;;  %v507_v56 = vld [vmem:[%s499_s15] sm:$0x3]  ;;  %s500_s17 = smov [#allocation28]  ;;  %s520_s18 = smov [#allocation29] }
 0x126   : >>> { %vm530_vm7 = vcmp.eq.s32.totalorder %v526_v7, %v523_v6  ;;  %v492_v57 = vrot.slane %v491_v55, 4  ;;  %v511_v58 = vsel %vm510_vm6, %v507_v56, 0.0  ;;  %v527_v59 = vld [vmem:[%s519_s16] sm:$0x3]  ;;  %s543_s29 = smov [#allocation28]  ;;  %s541_s15 = smov [#allocation27]  ;;  %v592_v6 = vmov %v1822_v6 }
 0x127   : >>> { %v512_v60 = vrot.slane %v511_v58, 4  ;;  %v531_v61 = vsel %vm530_vm7, %v527_v59, 0.0  ;;  %s545_s16 = smov [#allocation29]  ;;  %v595_v7 = vmov %v1824_v7  ;;  %v607_v6 = vmov %v1822_v6  ;;  %s1880_s26 = smov [#allocation24] }
 0x128   : >>> { %v493_v62 = vadd.f32 %v492_v57, %v491_v55  ;;  %v532_v63 = vrot.slane %v531_v61, 4  ;;  %v610_v7 = vmov %v1824_v7  ;;  %vm597_vm12 = vcmp.eq.s32.totalorder %v595_v7, %v592_v6  ;;  %s1882_s25 = smov [#allocation25]  ;;  %s1888_s28 = smov [#allocation15]  ;;  %v627_v54 = vld [vmem:[%s1880_s26] sm:$0x3] }
 0x129   : >>> { %v513_v0 = vadd.f32 %v512_v60, %v511_v58  ;;  %vm612_vm13 = vcmp.eq.s32.totalorder %v610_v7, %v607_v6  ;;  %s842_s30 = smov [#allocation34]  ;;  %s1894_s23 = smov [#allocation20]  ;;  %v628_v55 = vld [vmem:[%s1882_s25] sm:$0x3]  ;;  %v705_v6 = vmov %v1822_v6  ;;  %v708_v7 = vmov %v1824_v7 }
 0x12a   : >>> { %v494_v1 = vrot.slane %v493_v62, 2  ;;  %v533_v2 = vadd.f32 %v532_v63, %v531_v61  ;;  %v851_v58 = vld [vmem:[%s1888_s28] sm:$0x3]  ;;  %s620_s27 = smov [#allocation35]  ;;  %s844_s1 = smov [#allocation35]  ;;  %v719_v6 = vmov %v1822_v6  ;;  %v722_v7 = vmov %v1824_v7 }
 0x12b   : >>> { %v514_v3 = vrot.slane %v513_v0, 2  ;;  %v853_v61 = vld [vmem:[%s1894_s23] sm:$0x3]  ;;  %vm712_vm0 = vcmp.eq.s32.totalorder %v708_v7, %v705_v6  ;;  %v678_v6 = vmov %v1822_v6  ;;  %v681_v7 = vmov %v1824_v7  ;;  %s478_s24 = sadd.s32 1, %s1700_s24  }
 0x12c   : >>> { %v495_v4 = vadd.f32 %v494_v1, %v493_v62  ;;  %v534_v5 = vrot.slane %v533_v2, 2  ;;  %v692_v6 = vmov %v1822_v6  ;;  %v695_v7 = vmov %v1824_v7  ;;  %p475_p9 = scmp.ge.s32.totalorder %s478_s24, 3  }
 0x12d   : >>> { %v515_v8 = vadd.f32 %v514_v3, %v513_v0  ;;  %vm727_vm1 = vcmp.eq.s32.totalorder %v722_v7, %v719_v6  ;;  %vm686_vm3 = vcmp.eq.s32.totalorder %v681_v7, %v678_v6  ;;  %vm699_vm4 = vcmp.eq.s32.totalorder %v695_v7, %v692_v6 }
 0x12e   : >>> { %v496_v9 = vrot.slane %v495_v4, 1  ;;  %v535_v10 = vadd.f32 %v534_v5, %v533_v2  ;;  %vm741_vm5 = vcmp.eq.s32.totalorder %v1822_v6, 0  ;;  %vm745_vm6 = vcmp.eq.s32.totalorder %v1822_v6, 1 }
 0x12f   : >>> { %v516_v11 = vrot.slane %v515_v8, 1  ;;  %v379_v6 = vmov (%p475_p9), %v1822_v6  ;;  %v382_v7 = vmov (%p475_p9), %v1824_v7 }
 0x130   : >>> { %v497_v12 = vadd.f32 %v496_v9, %v495_v4  ;;  %v536_v13 = vrot.slane %v535_v10, 1  ;;  %v432_v6 = vmov (%p475_p9), %v1822_v6  ;;  %vm394_vm7 = vcmp.eq.s32.totalorder (%p475_p9), %v382_v7, %v379_v6 }
 0x131   : >>> { %v517_v14 = vadd.f32 %v516_v11, %v515_v8  ;;  %v435_v7 = vmov (%p475_p9), %v1824_v7  ;;  %v398_v6 = vmov (%p475_p9), %v1822_v6 }
 0x132   : >>> { %498 = vst [vmem:[%s480_s0] sm:$0x1] %v497_v12  ;;  %v537_v15 = vadd.f32 %v536_v13, %v535_v10  ;;  %s580_s0 = smov [#allocation30]  ;;  %v401_v7 = vmov (%p475_p9), %v1824_v7  ;;  %v415_v6 = vmov (%p475_p9), %v1822_v6 }
 0x133   : >>> { %518 = vst [vmem:[%s500_s17] sm:$0x1] %v517_v14  ;;  %s582_s17 = smov [#allocation31]  ;;  %v418_v7 = vmov (%p475_p9), %v1824_v7 }
 0x134   : >>> { %538 = vst [vmem:[%s520_s18] sm:$0x1] %v537_v15  ;;  %s539_s18 = smov [#allocation32] }
 0x135   : >>> { %s584_s18 = smov %s539_s18 }
 0x139   : >>> { %v542_v18 = vld [vmem:[%s541_s15] sm:$0xff]  ;;  %s588_s15 = smov [#allocation32] }
 0x13a   : >>> { %v544_v16 = vld [vmem:[%s543_s29] sm:$0xff]  ;;  %v565_v31 = vand.u32 2147483647, %v542_v18  ;;  %s540_s29 = smov [#allocation33] }
 0x13b   : >>> { %v548_v17 = vmul.f32 2.0, %v544_v16  ;;  %v546_v19 = vld [vmem:[%s545_s16] sm:$0xff]  ;;  %v566_v36 = vand.u32 2147483647, %v544_v16  ;;  %s586_s29 = smov %s540_s29  ;;  %s603_s16 = smov [#allocation33] }
 0x13c   : >>> { %v547_v20 = vsub.f32 %v546_v19, %v542_v18  ;;  %v567_v32 = vand.u32 2147483647, %v546_v19 }
 0x13d   : >>> { %1546 = vrcp.f32 %v548_v17 }
 0x13e   : >>> { %v568_v35 = vmin.f32 %v565_v31, %v567_v32 }
 0x140   : >>> { %v569_v37 = vmul.f32 1.1920929e-08, %v568_v35 }
 0x142   : >>> { %vm570_vm11 = vcmp.le.f32.partialorder %v566_v36, %v569_v37 }
 0x147   : >>> { %v1547_v21 = vpop.eup %1546 }
 0x148   : >>> { %v550_v22 = vmul.f32 %v1547_v21, %v547_v20 }
 0x14a   : >>> { %v552_v23 = vmul.f32 %v550_v22, %v550_v22  ;;  %vm551_vm10 = vcmp.ge.f32.partialorder %v550_v22, 0.0 }
 0x14c   : >>> { %v553_v24 = vadd.f32 1.0, %v552_v23 }
 0x14e   : >>> { %1548 = vrsqrt.f32 %v553_v24  ;;  %vm556_vm8 = vcmp.eq.f32.partialorder %v553_v24, inf  ;;  %v559_v26 = vand.u32 2147483648, %v553_v24  ;;  %vm558_vm9 = vcmp.eq.f32.partialorder %v553_v24, 0.0 }
 0x158   : >>> { %v1549_v25 = vpop.eup %1548 }
 0x159   : >>> { %v555_v27 = vmul.f32 %v1549_v25, %v553_v24 }
 0x15b   : >>> { %v557_v28 = vsel %vm556_vm8, %v553_v24, %v555_v27  ;;  %vm447_vm8 = vcmp.eq.s32.totalorder (%p475_p9), %v435_v7, %v432_v6 }
 0x15c   : >>> { %v560_v29 = vsel %vm558_vm9, %v559_v26, %v557_v28 }
 0x15d   : >>> { %v561_v30 = vxor.u32 2147483648, %v560_v29 }
 0x15f   : >>> { %v562_v33 = vsel %vm551_vm10, %v560_v29, %v561_v30 }
 0x160   : >>> { %v563_v34 = vadd.f32 %v562_v33, %v550_v22 }
 0x162   : >>> { %1550 = vrcp.f32 %v563_v34 }
 0x16c   : >>> { %v1551_v38 = vpop.eup %1550 }
 0x16d   : >>> { %v571_v39 = vsel %vm570_vm11, 0.0, %v1551_v38 }
 0x16e   : >>> { %v572_v40 = vmul.f32 %v571_v39, %v571_v39  ;;  %v576_v41 = vmul.f32 %v571_v39, %v544_v16 }
 0x170   : >>> { %v573_v42 = vadd.f32 1.0, %v572_v40  ;;  %v577_v43 = vsub.f32 %v542_v18, %v576_v41  ;;  %v579_v44 = vadd.f32 %v576_v41, %v546_v19 }
 0x172   : >>> { %1552 = vrsqrt.f32 %v573_v42  ;;  %581 = vst [vmem:[%s580_s0] sm:$0xff] %v577_v43  ;;  %583 = vst [vmem:[%s582_s17] sm:$0xff] %v579_v44  ;;  %s601_s0 = smov [#allocation34]  ;;  %s618_s17 = smov [#allocation34] }
 0x17c   : >>> { %v1553_v45 = vpop.eup %1552 }
 0x17d   : >>> { %585 = vst [vmem:[%s584_s18] sm:$0xff] %v1553_v45  ;;  %v575_v46 = vmul.f32 %v1553_v45, %v571_v39  ;;  %s1878_s18 = smov [#allocation23] }
 0x17e   : >>> { %v626_v53 = vld [vmem:[%s1878_s18] sm:$0x3] }
 0x17f   : >>> { %587 = vst [vmem:[%s586_s29] sm:$0xff] %v575_v46  ;;  %s616_s29 = smov [#allocation35] }
 0x184   : >>> { %v589_v47 = vld [vmem:[%s588_s15] ss:$0 sm:$0xff]  ;;  %s1884_s15 = smov [#allocation26] }
 0x185   : >>> { %v598_v48 = vsel %vm597_vm12, %v589_v47, 0.0  ;;  %v629_v56 = vld [vmem:[%s1884_s15] sm:$0x3] }
 0x186   : >>> { %599 = vadd.xlane.f32.xlu0 %v598_v48  ;;  %v604_v49 = vld [vmem:[%s603_s16] ss:$0 sm:$0xff]  ;;  %s1886_s16 = smov [#allocation12] }
 0x187   : >>> { %v613_v50 = vsel %vm612_vm13, %v604_v49, 0.0  ;;  %v850_v57 = vld [vmem:[%s1886_s16] sm:$0x3] }
 0x18a   : >>> { %614 = vadd.xlane.f32.xlu0 %v613_v50 }
 0x213   : >>> { %v600_v51 = vpop.xlane.xlu0 %599 }
 0x214   : >>> { %602 = vst [vmem:[%s601_s0] sm:$0xff] %v600_v51  ;;  %s1890_s0 = smov [#allocation18] }
 0x215   : >>> { %v852_v59 = vld [vmem:[%s1890_s0] sm:$0x3] }
 0x217   : >>> { %v615_v52 = vpop.xlane.xlu0 %614 }
 0x218   : >>> { %617 = vst [vmem:[%s616_s29] sm:$0xff] %v615_v52  ;;  %s1914_s29 = smov [#allocation26] }
 0x21b   : >>> { %v619_v60 = vld [vmem:[%s618_s17] sm:$0xff]  ;;  %s1912_s17 = smov [#allocation25] }
 0x21c   : >>> { %v843_v62 = vld [vmem:[%s842_s30] sm:$0xff]  ;;  %v630_v63 = vmul.f32 %v626_v53, %v619_v60  ;;  %v633_v0 = vmul.f32 %v627_v54, %v619_v60  ;;  %v637_v1 = vmul.f32 %v628_v55, %v619_v60  ;;  %v640_v2 = vmul.f32 %v629_v56, %v619_v60  ;;  %s1910_s30 = smov [#allocation12] }
 0x21d   : >>> { %v854_v3 = vmul.f32 %v850_v57, %v843_v62  ;;  %v857_v4 = vmul.f32 %v851_v58, %v843_v62  ;;  %v861_v5 = vmul.f32 %v852_v59, %v843_v62  ;;  %v864_v8 = vmul.f32 %v853_v61, %v843_v62 }
 0x21f   : >>> { %v621_v9 = vld [vmem:[%s620_s27] sm:$0xff]  ;;  %s648_s27 = smov [#allocation33] }
 0x220   : >>> { %v845_v10 = vld [vmem:[%s844_s1] sm:$0xff]  ;;  %v631_v11 = vmul.f32 %v628_v55, %v621_v9  ;;  %v634_v12 = vmul.f32 %v629_v56, %v621_v9  ;;  %v636_v13 = vmul.f32 %v626_v53, %v621_v9  ;;  %v639_v14 = vmul.f32 %v627_v54, %v621_v9  ;;  %s646_s1 = smov [#allocation32] }
 0x221   : >>> { %v855_v15 = vmul.f32 %v852_v59, %v845_v10  ;;  %v858_v16 = vmul.f32 %v853_v61, %v845_v10  ;;  %v860_v17 = vmul.f32 %v850_v57, %v845_v10  ;;  %v863_v18 = vmul.f32 %v851_v58, %v845_v10  ;;  %v647_v27 = vld [vmem:[%s646_s1] ss:$0 sm:$0xff]  ;;  %s675_s1 = smov [#allocation30] }
 0x222   : >>> { %v632_v19 = vsub.f32 %v630_v63, %v631_v11  ;;  %v635_v20 = vsub.f32 %v633_v0, %v634_v12  ;;  %v638_v21 = vadd.f32 %v637_v1, %v636_v13  ;;  %v641_v22 = vadd.f32 %v640_v2, %v639_v14  ;;  %v649_v28 = vld [vmem:[%s648_s27] ss:$0 sm:$0xff]  ;;  %s674_s27 = smov [#allocation23] }
 0x223   : >>> { %v856_v23 = vsub.f32 %v854_v3, %v855_v15  ;;  %v859_v24 = vsub.f32 %v857_v4, %v858_v16  ;;  %v862_v25 = vadd.f32 %v861_v5, %v860_v17  ;;  %v865_v26 = vadd.f32 %v864_v8, %v863_v18  ;;  %v682_v63 = vld [vmem:[%s675_s1] ss:$0 sm:$0xff]  ;;  %s918_s1 = sadd.s32 (%p475_p9), 1, %s1696_s21  }
 0x224   : >>> { %643 = vst [vmem:[%s1880_s26] sm:$0x3] %v635_v20  ;;  %645 = vst [vmem:[%s1884_s15] sm:$0x3] %v641_v22  ;;  %s1916_s26 = smov [#allocation23]  ;;  %s716_s15 = smov [#allocation31] }
 0x225   : >>> { %642 = vst [vmem:[%s1878_s18] sm:$0x3] %v632_v19  ;;  %644 = vst [vmem:[%s1882_s25] sm:$0x3] %v638_v21  ;;  %s1918_s25 = smov [#allocation18]  ;;  %s1926_s18 = smov [#allocation24]  ;;  %v723_v59 = vld [vmem:[%s716_s15] ss:$0 sm:$0xff] }
 0x226   : >>> { %866 = vst [vmem:[%s1886_s16] sm:$0x3] %v856_v23  ;;  %867 = vst [vmem:[%s1888_s28] sm:$0x3] %v859_v24  ;;  %s1920_s28 = smov [#allocation15]  ;;  %s702_s16 = smov [#allocation25] }
 0x227   : >>> { %868 = vst [vmem:[%s1890_s0] sm:$0x3] %v862_v25  ;;  %869 = vst [vmem:[%s1894_s23] sm:$0x3] %v865_v26  ;;  %s1924_s23 = smov [#allocation20]  ;;  %s715_s0 = smov [#allocation26] }
 0x228   : >>> { %s818_s15 = smov [#allocation24]  ;;  %p471_p10 = scmp.ge.s32.totalorder (%p475_p9), %s918_s1, 15 }
 0x229   : >> { %s2176_s21 = smov (%p475_p9), %s918_s1 }
 0x22b   : >>> { %v657_v30 = vld [vmem:[%s1914_s29] sm:$0x3] }
 0x22c   : >>> { %v656_v29 = vld [vmem:[%s1912_s17] sm:$0x3]  ;;  %v665_v36 = vmul.f32 %v657_v30, %v649_v28  ;;  %v668_v42 = vmul.f32 %v657_v30, %v647_v27 }
 0x22d   : >>> { %v654_v31 = vld [vmem:[%s1916_s26] sm:$0x3]  ;;  %v664_v35 = vmul.f32 %v656_v29, %v647_v27  ;;  %v667_v37 = vmul.f32 %v656_v29, %v649_v28 }
 0x22e   : >>> { %v872_v32 = vld [vmem:[%s1910_s30] ss:$0 sm:$0xff]  ;;  %v1469_v34 = vld [vmem:[%s1910_s30 + $0x1] ss:$0 sm:$0xff]  ;;  %v658_v48 = vmul.f32 %v654_v31, %v647_v27  ;;  %v661_v49 = vmul.f32 %v654_v31, %v649_v28 }
 0x22f   : >>> { %v1468_v33 = vld [vmem:[%s1910_s30 - $0x1] sm:$0x2]  ;;  %v1471_v40 = vld [vmem:[%s1918_s25 + $0x1] sm:$0x1]  ;;  %v666_v47 = vsub.f32 %v664_v35, %v665_v36  ;;  %v669_v53 = vadd.f32 %v668_v42, %v667_v37 }
 0x230   : >>> { %v879_v38 = vsel %vm802_vm14, %v872_v32, %v1468_v33  ;;  %v883_v39 = vld [vmem:[%s1918_s25] ss:$0 sm:$0xff]  ;;  %v891_v43 = vsel %vm814_vm15, %v1469_v34, %v1471_v40  ;;  %v1473_v45 = vld [vmem:[%s1920_s28 + $0x1] ss:$0 sm:$0xff] }
 0x231   : >>> { %v896_v41 = vld [vmem:[%s1920_s28] ss:$0 sm:$0xff]  ;;  %882 = vst [vmem:[%s1910_s30] sm:$0x3] %v879_v38  ;;  %893 = vst [vmem:[%s1918_s25] sm:$0x3] %v891_v43  ;;  %v1475_v51 = vld [vmem:[%s1924_s23 + $0x1] sm:$0x1] }
 0x232   : >>> { %v1472_v44 = vld [vmem:[%s1920_s28 - $0x1] sm:$0x2]  ;;  %1470 = vst [vmem:[%s1910_s30 + $0x1] sm:$0x1] %v883_v39  ;;  %v915_v54 = vsel %vm814_vm15, %v1473_v45, %v1475_v51  ;;  %672 = vst [vmem:[%s1912_s17] sm:$0x3] %v666_v47  ;;  %s689_s30 = smov [#allocation24] }
 0x233   : >>> { %v907_v46 = vld [vmem:[%s1924_s23] ss:$0 sm:$0xff]  ;;  %v903_v50 = vsel %vm802_vm14, %v896_v41, %v1472_v44  ;;  %673 = vst [vmem:[%s1914_s29] sm:$0x3] %v669_v53  ;;  %s1968_s17 = smov [#allocation25]  ;;  %s1703_s29 = smov 1  }
 0x234   : >>> { %v655_v52 = vld [vmem:[%s1926_s18] sm:$0x3]  ;;  %906 = vst [vmem:[%s1920_s28] sm:$0x3] %v903_v50  ;;  %917 = vst [vmem:[%s1924_s23] sm:$0x3] %v915_v54  ;;  %s731_s25 = smov [#allocation24]  ;;  %s1971_s23 = smov [#allocation26] }
 0x235   : >>> { %v659_v55 = vmul.f32 %v655_v52, %v649_v28  ;;  %v662_v56 = vmul.f32 %v655_v52, %v647_v27  ;;  %1474 = vst [vmem:[%s1920_s28 + $0x1] sm:$0x1] %v907_v46  ;;  %s1704_s28 = smov 127  }
 0x237   : >>> { %v660_v57 = vsub.f32 %v658_v48, %v659_v55  ;;  %v663_v58 = vadd.f32 %v662_v56, %v661_v49 }
 0x239   : >>> { %670 = vst [vmem:[%s1916_s26] sm:$0x3] %v660_v57  ;;  %671 = vst [vmem:[%s1926_s18] sm:$0x3] %v663_v58  ;;  %v709_v60 = vld [vmem:[%s702_s16] sm:$0x3]  ;;  %s730_s26 = smov [#allocation23]  ;;  %s794_s18 = smov [#allocation23] }
 0x23a   : >>> { %v713_v61 = vsel %vm712_vm0, 0.0, %v709_v60  ;;  %v724_v62 = vld [vmem:[%s715_s0] sm:$0x3] }
 0x23b   : >>> { %714 = vst [vmem:[%s702_s16] sm:$0x3] %v713_v61  ;;  %v728_v0 = vsel %vm727_vm1, %v723_v59, %v724_v62  ;;  %s795_s16 = smov [#allocation25] }
 0x23c   : >>> { %729 = vst [vmem:[%s715_s0] sm:$0x3] %v728_v0  ;;  %s819_s0 = smov [#allocation26] }
 0x240   : >>> { %v683_v1 = vld [vmem:[%s674_s27] sm:$0x3] }
 0x241   : >>> { %v696_v2 = vld [vmem:[%s689_s30] sm:$0x3]  ;;  %v687_v3 = vsel %vm686_vm3, %v682_v63, %v683_v1 }
 0x242   : >>> { %v700_v4 = vsel %vm699_vm4, 0.0, %v696_v2  ;;  %688 = vst [vmem:[%s674_s27] sm:$0x3] %v687_v3  ;;  %v768_v5 = vld [vmem:[%s1968_s17] sm:$0x3]  ;;  %s383_s27 = smov (%p475_p9), [#allocation23] }
 0x243   : >>> { %701 = vst [vmem:[%s689_s30] sm:$0x3] %v700_v4  ;;  %769 = vrot.lane.b32.xlu0 %v768_v5, %s1703_s29  ;;  %v764_v11 = vld [vmem:[%s1971_s23] sm:$0x3]  ;;  %s402_s30 = smov (%p475_p9), [#allocation24] }
 0x244   : >>> { %v785_v12 = vld [vmem:[%s1971_s23] sm:$0x3] }
 0x245   : >>> { %v767_v30 = vld [vmem:[%s1968_s17] sm:$0x3] }
 0x249   : >>> { %v736_v8 = vld [vmem:[%s730_s26] sm:$0x3] }
 0x24a   : >>> { %737 = vrot.lane.b32.xlu1 %v736_v8, %s1703_s29  ;;  %v732_v9 = vld [vmem:[%s731_s25] sm:$0x3] }
 0x24b   : >>> { %v753_v10 = vld [vmem:[%s731_s25] sm:$0x3] }
 0x24c   : >>> { %v735_v18 = vld [vmem:[%s730_s26] sm:$0x3] }
 0x24e   : >>> { %733 = vrot.lane.b32.xlu1 %v732_v9, %s1703_s29 }
 0x252   : >>> { %754 = vrot.lane.b32.xlu1 %v753_v10, %s1704_s28 }
 0x256   : >>> { %765 = vrot.lane.b32.xlu1 %v764_v11, %s1703_s29  ;;  %s436_s29 = smov (%p475_p9), [#allocation26] }
 0x25a   : >>> { %786 = vrot.lane.b32.xlu1 %v785_v12, %s1704_s28 }
 0x2b5   : >>> { %v770_v20 = vpop.permute.xlu0 %769 }
 0x2b6   : >>> { %v774_v22 = vsel %vm741_vm5, %v768_v5, %v770_v20 }
 0x2bc   : >>> { %v738_v13 = vpop.permute.xlu1 %737 }
 0x2bd   : >>> { %v742_v14 = vsel %vm741_vm5, %v736_v8, %v738_v13 }
 0x2c0   : >>> { %v734_v15 = vpop.permute.xlu1 %733 }
 0x2c1   : >>> { %v746_v16 = vsel %vm745_vm6, %v734_v15, %v742_v14 }
 0x2c2   : >>> { %v752_v17 = vsel %vm1329_vm2, %v746_v16, 0.0 }
 0x2c3   : >>> { %760 = vst [vmem:[%s730_s26] sm:$0x3] %v752_v17 }
 0x2c4   : >>> { %v755_v19 = vpop.permute.xlu1 %754 }
 0x2c5   : >>> { %v759_v21 = vsel %vm745_vm6, %v735_v18, %v755_v19 }
 0x2c6   : >>> { %761 = vst [vmem:[%s731_s25] sm:$0x3] %v759_v21 }
 0x2c8   : >>> { %v766_v23 = vpop.permute.xlu1 %765 }
 0x2c9   : >>> { %v778_v24 = vsel %vm745_vm6, %v766_v23, %v774_v22 }
 0x2ca   : >>> { %v796_v25 = vld [vmem:[%s794_s18] ss:$0 sm:$0xff]  ;;  %v1461_v27 = vld [vmem:[%s794_s18 + $0x1] ss:$0 sm:$0xff]  ;;  %v784_v29 = vsel %vm1329_vm2, %v778_v24, 0.0 }
 0x2cb   : >>> { %v1460_v26 = vld [vmem:[%s794_s18 - $0x1] sm:$0x2]  ;;  %792 = vst [vmem:[%s1968_s17] sm:$0x3] %v784_v29  ;;  %s419_s17 = smov (%p475_p9), [#allocation25] }
 0x2cc   : >>> { %v803_v28 = vsel %vm802_vm14, %v796_v25, %v1460_v26  ;;  %v787_v31 = vpop.permute.xlu1 %786 }
 0x2cd   : >>> { %806 = vst [vmem:[%s794_s18] sm:$0x3] %v803_v28  ;;  %v820_v32 = vld [vmem:[%s818_s15] ss:$0 sm:$0xff]  ;;  %v1465_v34 = vld [vmem:[%s818_s15 + $0x1] ss:$0 sm:$0xff]  ;;  %v791_v35 = vsel %vm745_vm6, %v767_v30, %v787_v31 }
 0x2ce   : >>> { %v1464_v33 = vld [vmem:[%s818_s15 - $0x1] sm:$0x2]  ;;  %793 = vst [vmem:[%s1971_s23] sm:$0x3] %v791_v35 }
 0x2cf   : >>> { %v827_v36 = vsel %vm802_vm14, %v820_v32, %v1464_v33 }
 0x2d0   : >>> { %830 = vst [vmem:[%s818_s15] sm:$0x3] %v827_v36 }
 0x2d2   : >>> { %v807_v37 = vld [vmem:[%s795_s16] ss:$0 sm:$0xff]  ;;  %v1463_v38 = vld [vmem:[%s795_s16 + $0x1] sm:$0x1] }
 0x2d3   : >>> { %1462 = vst [vmem:[%s794_s18 + $0x1] sm:$0x1] %v807_v37  ;;  %v815_v39 = vsel %vm814_vm15, %v1461_v27, %v1463_v38  ;;  %477 = sbr.rel (!%p475_p9) target bundleno = 291 (0x123), region = 344 }
 0x2d4   : >>> { %817 = vst [vmem:[%s795_s16] sm:$0x3] %v815_v39 }
 0x2d5   : >>> { %v831_v40 = vld [vmem:[%s819_s0] ss:$0 sm:$0xff]  ;;  %v1467_v41 = vld [vmem:[%s819_s0 + $0x1] sm:$0x1] }
 0x2d6   : >>> { %1466 = vst [vmem:[%s818_s15 + $0x1] sm:$0x1] %v831_v40  ;;  %v839_v42 = vsel %vm814_vm15, %v1465_v34, %v1467_v41 }
 0x2d7   : >>> { %841 = vst [vmem:[%s819_s0] sm:$0x3] %v839_v42 }
 0x2da   : >> { %v389_v43 = vld [vmem:[%s383_s27] sm:$0x3] }
 0x2db   : >> { %v390_v45 = vsel %vm1329_vm2, %v389_v43, 0.0  ;;  %v425_v47 = vld [vmem:[%s419_s17] sm:$0x3] }
 0x2dc   : >> { %v391_v49 = vmul.f32 %v390_v45, %v390_v45  ;;  %v426_v51 = vsel %vm1329_vm2, %v425_v47, 0.0 }
 0x2dd   : >> { %v408_v44 = vld [vmem:[%s402_s30] sm:$0x3]  ;;  %v427_v53 = vmul.f32 %v426_v51, %v426_v51 }
 0x2de   : >> { %v409_v46 = vsel %vm1329_vm2, %v408_v44, 0.0  ;;  %v442_v48 = vld [vmem:[%s436_s29] sm:$0x3]  ;;  %v395_v56 = vsel %vm394_vm7, 0.0, %v391_v49 }
 0x2df   : >> { %v410_v50 = vmul.f32 %v409_v46, %v409_v46  ;;  %v443_v52 = vsel %vm1329_vm2, %v442_v48, 0.0 }
 0x2e0   : >> { %v444_v55 = vmul.f32 %v443_v52, %v443_v52 }
 0x2e1   : >> { %v412_v54 = vadd.f32 %v410_v50, %v391_v49  ;;  %v411_v57 = vadd.f32 %v410_v50, %v395_v56 }
 0x2e2   : >> { %v448_v60 = vsel %vm447_vm8, 0.0, %v444_v55 }
 0x2e3   : >> { %v429_v58 = vadd.f32 %v427_v53, %v412_v54  ;;  %v428_v59 = vadd.f32 %v427_v53, %v411_v57 }
 0x2e5   : >> { %v450_v61 = vadd.f32 %v444_v55, %v429_v58  ;;  %v449_v62 = vadd.f32 %v448_v60, %v428_v59 }
 0x2e7   : >> { %451 = vadd.xlane.f32.xlu0 %v450_v61 }
 0x2eb   : >> { %459 = vadd.xlane.f32.xlu0 %v449_v62 }
 0x374   : >> { %v452_v63 = vpop.xlane.xlu0 %451 }
 0x375   : >> { %v453_v0 = vrot.slane %v452_v63, 4 }
 0x377   : >> { %v454_v1 = vadd.f32 %v453_v0, %v452_v63 }
 0x378   : >> { %v460_v2 = vpop.xlane.xlu0 %459 }
 0x379   : >> { %v455_v3 = vrot.slane %v454_v1, 2  ;;  %v461_v4 = vrot.slane %v460_v2, 4 }
 0x37b   : >> { %v462_v5 = vadd.f32 %v461_v4, %v460_v2  ;;  %v456_v8 = vadd.f32 %v455_v3, %v454_v1 }
 0x37d   : >> { %v463_v9 = vrot.slane %v462_v5, 2  ;;  %v457_v11 = vrot.slane %v456_v8, 1 }
 0x37f   : >> { %v464_v10 = vadd.f32 %v463_v9, %v462_v5  ;;  %v458_v14 = vadd.f32 %v457_v11, %v456_v8 }
 0x381   : >> { %v465_v12 = vrot.slane %v464_v10, 1 }
 0x383   : >> { %v466_v13 = vadd.f32 %v465_v12, %v464_v10 }
 0x385   : >> { %1494 = vpush %v466_v13 }
 0x386   : >> { %1496 = vpush %v458_v14 }
 0x3b6   : >> { %s1495_s24 = spop %1494 }
 0x3b7   : >> { %s1497_s26 = spop %1496 }
 0x3b8   : >> { %s469_s25 = smul.f32 1e-10, %s1497_s26 }
 0x3ba   : >> { %p470_p11 = scmp.le.f32.partialorder %s1495_s24, %s469_s25 }
 0x3bc   : >> { %p472_p12 = por %p471_p10, %p470_p11 }
 0x3be   : > { %920 = sbr.rel (!%p472_p12) target bundleno = 290 (0x122), region = 355 }
 0x3c5 PF: > { %s925_s28 = smov [#allocation23]  ;;  %v929_v6 = vmov %v1822_v6  ;;  %v932_v7 = vmov %v1824_v7  ;;  %v980_v15 = vld [vmem:[#allocation12] sm:$0x3]  ;;  %v986_v16 = vld [vmem:[#allocation15] sm:$0x3]  ;;  %s2177_s21 = scalar_lea.vmem [#allocation13], %s1818_s19 }
 0x3c6   : > { %v949_v6 = vmov %v1822_v6  ;;  %v952_v7 = vmov %v1824_v7  ;;  %v933_v17 = vld [vmem:[%s925_s28] sm:$0x3]  ;;  %vm936_vm9 = vcmp.eq.s32.totalorder %v932_v7, %v929_v6  ;;  %982 = vst [vmem:[%s2177_s21] sm:$0x3] %v980_v15  ;;  %s2178_s23 = scalar_lea.vmem [#allocation16], %s1818_s19  ;;  %s945_s18 = smov [#allocation26] }
 0x3c7   : > { %vm956_vm10 = vcmp.eq.s32.totalorder %v952_v7, %v949_v6  ;;  %988 = vst [vmem:[%s2178_s23] sm:$0x3] %v986_v16  ;;  %v992_v18 = vld [vmem:[#allocation18] sm:$0x3]  ;;  %v937_v19 = vsel %vm936_vm9, %v933_v17, 0.0  ;;  %s2179_s15 = scalar_lea.vmem [#allocation19], %s1818_s19  ;;  %s2180_s16 = scalar_lea.vmem [#allocation21], %s1818_s19 }
 0x3c8   : > { %994 = vst [vmem:[%s2179_s15] sm:$0x3] %v992_v18  ;;  %v998_v20 = vld [vmem:[#allocation20] sm:$0x3]  ;;  %v938_v21 = vrot.slane %v937_v19, 4  ;;  %v953_v22 = vld [vmem:[%s945_s18] sm:$0x3] }
 0x3c9   : > { %1000 = vst [vmem:[%s2180_s16] sm:$0x3] %v998_v20  ;;  %v957_v23 = vsel %vm956_vm10, %v953_v22, 0.0  ;;  %s921_s0 = sand.u32 7, %s1775_s12   ;;  %s2181_s30 = scalar_lea.vmem [#allocation9], %s1820_s22 }
 0x3ca   : > { %v939_v24 = vadd.f32 %v938_v21, %v937_v19  ;;  %v958_v25 = vrot.slane %v957_v23, 4  ;;  %s922_s1 = scalar_lea.vmem [#allocation8], %s921_s0  ;;  %s924_s27 = scalar_lea.vmem [#allocation10], %s921_s0 }
 0x3cb   : > { %s926_s1 = smov %s922_s1  ;;  %s946_s27 = smov %s924_s27 }
 0x3cc   : > { %v940_v26 = vrot.slane %v939_v24, 2  ;;  %v959_v6 = vadd.f32 %v958_v25, %v957_v23  ;;  %s2182_s17 = scalar_lea.vmem [#allocation11], %s1820_s22  ;;  %s1010_s29 = scalar_lea.sflag [#allocation14], %s1814_s13 }
 0x3cd   : > { %s1015_s24 = scalar_lea.sflag [#allocation17], %s1814_s13  ;;  %s1025_s26 = scalar_lea.sflag [#allocation22], %s1814_s13 }
 0x3ce   : > { %v941_v7 = vadd.f32 %v940_v26, %v939_v24  ;;  %v960_v27 = vrot.slane %v959_v6, 2  ;;  %s1032_s25 = sshrl.u32 (%p1790_p3), %s1775_s12, 3  ;;  %s2183_s28 = scalar_lea.vmem (%p1790_p3), [#allocation9], %s1820_s22 }
 0x3cf   : > { %s1482_s21 = sshll.u32 (%p1790_p3), %s1032_s25, 1 }
 0x3d0   : > { %v942_v28 = vrot.slane %v941_v7, 1  ;;  %v961_v29 = vadd.f32 %v960_v27, %v959_v6  ;;  %s1034_s15 = scalar_lea.vmem (%p1790_p3), %s2164_s4, %s1482_s21 }
 0x3d2   : > { %v943_v30 = vadd.f32 %v942_v28, %v941_v7  ;;  %v962_v31 = vrot.slane %v961_v29, 1 }
 0x3d4   : > { %944 = vst [vmem:[%s926_s1] sm:$0x1] %v943_v30  ;;  %v963_v32 = vadd.f32 %v962_v31, %v961_v29 }
 0x3d6   : > { %964 = vst [vmem:[%s946_s27] sm:$0x1] %v963_v32 }
 0x3d8   : > { %1031 = sbr.rel (!%p1790_p3) target bundleno = 997 (0x3e5), region = 158 }
 0x3db   : > { %v968_v33 = vld [vmem:[#allocation8] sm:$0x3] }
 0x3dc   : > { %970 = vst [vmem:[%s2181_s30] sm:$0x3] %v968_v33 }
 0x3dd   : > { %v974_v34 = vld [vmem:[#allocation10] sm:$0x3] }
 0x3de   : > { %976 = vst [vmem:[%s2182_s17] sm:$0x3] %v974_v34 }
 0x3e3   : > { %v1050_v35 = vld [vmem:[%s2183_s28] sm:$0x3] }
 0x3e4   : > { %1051 = vst [vmem:[%s1034_s15] sm:$0x3] %v1050_v35 }
 0x3e5 PF: > { %1068 = sbr.rel (!%p1790_p3) target bundleno = 1005 (0x3ed), region = 192  ;;  %s1069_s16 = sshrl.u32 (%p1790_p3), %s1775_s12, 3 }
 0x3e6   : > { %s2184_s0 = scalar_lea.vmem (%p1790_p3), [#allocation11], %s1820_s22  ;;  %s1483_s1 = sshll.u32 (%p1790_p3), %s1069_s16, 1 }
 0x3e7   : > { %s1071_s17 = scalar_lea.vmem (%p1790_p3), %s2165_s5, %s1483_s1 }
 0x3eb   : > { %v1087_v36 = vld [vmem:[%s2184_s0] sm:$0x3] (%p1790_p3) }
 0x3ec   : > { %1088 = vst [vmem:[%s1071_s17] sm:$0x3] %v1087_v36 }
 0x3ed PF: > { %s2064_s25 = sshll.u32 %s1775_s12, 5  ;;  %s2185_s28 = scalar_lea.vmem [#allocation16], %s1818_s19 }
 0x3ee   : > { %s1119_s20 = sshll.u32 %s2185_s28, 4  ;;  %s1117_s18 = scalar_lea.hbm %s2167_s7, %s2064_s25  ;;  %s1120_s20 = int_to_ptr.vmem [resolvable:$true] %s1119_s20 }
 0x3ef   : > { %s1554_s22 = scalar_lea.vmem %s1120_s20, 32  ;;  %s1705_s15 = smov [#allocation16]  }
 0x3f0   : > { %p1555_p13 = scmp.ne.s32.totalorder %s1120_s20, %s1554_s22  ;;  %s1556_s16 = sshll.u32 %s1705_s15, 4  ;;  %s1557_s16 = int_to_ptr.vmem [resolvable:$false] %s1556_s16 }
 0x3f1   : > { %s1558_s0 = scalar_lea.vmem %s1557_s16, 64  ;;  %p1559_p0 = scmp.lt.s32.totalorder %s1120_s20, %s1557_s16 }
 0x3f2   : > { %p1560_p1 = scmp.lt.s32.totalorder %s1558_s0, %s1554_s22 }
 0x3f4   : > { %p1561_p2 = por %p1560_p1, %p1559_p0 }
 0x3f6   : > { %p1562_p3 = pnand %p1561_p2, %p1555_p13 }
 0x3f8   : > { %1565 = shalt.err (!%p1562_p3)
}
 0x3f9   : > { %s1566_s12 = scalar_lea.hbm %s1117_s18, 32  ;;  %s1568_s30 = scalar_lea.hbm %s2167_s7, 64 }
 0x3fa   : > { %p1567_p5 = scmp.ne.s32.totalorder %s1117_s18, %s1566_s12  ;;  %p1569_p6 = scmp.lt.u32.totalorder %s1117_s18, %s2167_s7 }
 0x3fb   : > { %p1570_p7 = scmp.lt.u32.totalorder %s1568_s30, %s1566_s12  ;;  %p1572_p9 = scmp.lt.u32.totalorder %s1566_s12, %s1117_s18 }
 0x3fd   : > { %p1571_p8 = por %p1570_p7, %p1569_p6 }
 0x3ff   : > { %p1573_p10 = por %p1572_p9, %p1571_p8 }
 0x401   : > { %p1574_p11 = pnand %p1573_p10, %p1567_p5 }
 0x403   : > { %1577 = shalt.err (!%p1574_p11)
}
 0x404   : > { %1122 = dma.vmem_to_hbm [thread:$0]  %s1120_s20, 32, %s1117_s18, %s1015_s24  }
 0x405   : > { %s1107_s22 = scalar_lea.hbm %s2166_s6, %s2064_s25  ;;  %s2186_s15 = scalar_lea.vmem [#allocation13], %s1818_s19 }
 0x406   : > { %s1109_s16 = sshll.u32 %s2186_s15, 4  ;;  %s2090_s12 = scalar_lea.hbm %s2168_s8, %s2064_s25  ;;  %s1110_s16 = int_to_ptr.vmem [resolvable:$true] %s1109_s16 }
 0x407   : > { %s1578_s27 = scalar_lea.vmem %s1110_s16, 32  ;;  %s1706_s30 = smov [#allocation13]  }
 0x408   : > { %p1579_p12 = scmp.ne.s32.totalorder %s1110_s16, %s1578_s27  ;;  %s1580_s17 = sshll.u32 %s1706_s30, 4  ;;  %s1581_s17 = int_to_ptr.vmem [resolvable:$false] %s1580_s17 }
 0x409   : > { %s1582_s28 = scalar_lea.vmem %s1581_s17, 64  ;;  %p1583_p13 = scmp.lt.s32.totalorder %s1110_s16, %s1581_s17 }
 0x40a   : > { %p1584_p0 = scmp.lt.s32.totalorder %s1582_s28, %s1578_s27 }
 0x40c   : > { %p1585_p1 = por %p1584_p0, %p1583_p13 }
 0x40e   : > { %p1586_p2 = pnand %p1585_p1, %p1579_p12 }
 0x410   : > { %1589 = shalt.err (!%p1586_p2)
}
 0x411   : > { %s1590_s20 = scalar_lea.hbm %s1107_s22, 32  ;;  %s1592_s23 = scalar_lea.hbm %s2166_s6, 64 }
 0x412   : > { %p1591_p3 = scmp.ne.s32.totalorder %s1107_s22, %s1590_s20  ;;  %p1593_p5 = scmp.lt.u32.totalorder %s1107_s22, %s2166_s6 }
 0x413   : > { %p1594_p6 = scmp.lt.u32.totalorder %s1592_s23, %s1590_s20  ;;  %p1596_p8 = scmp.lt.u32.totalorder %s1590_s20, %s1107_s22 }
 0x415   : > { %p1595_p7 = por %p1594_p6, %p1593_p5 }
 0x417   : > { %p1597_p9 = por %p1596_p8, %p1595_p7 }
 0x419   : > { %p1598_p10 = pnand %p1597_p9, %p1591_p3 }
 0x41b   : > { %1601 = shalt.err (!%p1598_p10)
}
 0x41c   : > { %1112 = dma.vmem_to_hbm [thread:$0]  %s1110_s16, 32, %s1107_s22, %s1010_s29  }
 0x41d   : > { %s2187_s1 = scalar_lea.vmem [#allocation19], %s1818_s19  ;;  %s2106_s28 = scalar_lea.hbm %s2169_s9, %s2064_s25 }
 0x41e   : > { %s1129_s27 = sshll.u32 %s2187_s1, 4  ;;  %s2188_s18 = scalar_lea.vmem [#allocation21], %s1818_s19  ;;  %s1130_s27 = int_to_ptr.vmem [resolvable:$true] %s1129_s27 }
 0x41f   : > { %s1139_s21 = sshll.u32 %s2188_s18, 4  ;;  %s1602_s20 = scalar_lea.vmem %s1130_s27, 32  ;;  %s1140_s21 = int_to_ptr.vmem [resolvable:$true] %s1139_s21 }
 0x420   : > { %p1603_p11 = scmp.ne.s32.totalorder %s1130_s27, %s1602_s20  ;;  %s1707_s23 = smov [#allocation19]  }
 0x421   : > { %s1604_s15 = sshll.u32 %s1707_s23, 4  ;;  %s1605_s15 = int_to_ptr.vmem [resolvable:$false] %s1604_s15 }
 0x422   : > { %s1606_s0 = scalar_lea.vmem %s1605_s15, 64  ;;  %p1607_p12 = scmp.lt.s32.totalorder %s1130_s27, %s1605_s15 }
 0x423   : > { %p1608_p13 = scmp.lt.s32.totalorder %s1606_s0, %s1602_s20 }
 0x425   : > { %p1609_p0 = por %p1608_p13, %p1607_p12 }
 0x427   : > { %p1610_p1 = pnand %p1609_p0, %p1603_p11 }
 0x429   : > { %1613 = shalt.err (!%p1610_p1)
}
 0x42a   : > { %s1614_s29 = scalar_lea.hbm %s2090_s12, 32  ;;  %s1616_s22 = scalar_lea.hbm %s2168_s8, 64 }
 0x42b   : > { %p1615_p2 = scmp.ne.s32.totalorder %s2090_s12, %s1614_s29  ;;  %p1617_p3 = scmp.lt.u32.totalorder %s2090_s12, %s2168_s8 }
 0x42c   : > { %p1618_p5 = scmp.lt.u32.totalorder %s1616_s22, %s1614_s29  ;;  %p1620_p7 = scmp.lt.u32.totalorder %s1614_s29, %s2090_s12 }
 0x42e   : > { %p1619_p6 = por %p1618_p5, %p1617_p3 }
 0x430   : > { %p1621_p8 = por %p1620_p7, %p1619_p6 }
 0x432   : > { %p1622_p9 = pnand %p1621_p8, %p1615_p2 }
 0x434   : > { %1625 = shalt.err (!%p1622_p9)
}
 0x435   : > { %1132 = dma.vmem_to_hbm [thread:$0]  %s1130_s27, 32, %s2090_s12, %s1015_s24  }
 0x436   : > { %s1626_s30 = scalar_lea.vmem %s1140_s21, 32  ;;  %s1708_s17 = smov [#allocation21]  }
 0x437   : > { %p1627_p10 = scmp.ne.s32.totalorder %s1140_s21, %s1626_s30  ;;  %s1628_s18 = sshll.u32 %s1708_s17, 4  ;;  %s1629_s18 = int_to_ptr.vmem [resolvable:$false] %s1628_s18 }
 0x438   : > { %s1630_s20 = scalar_lea.vmem %s1629_s18, 64  ;;  %p1631_p11 = scmp.lt.s32.totalorder %s1140_s21, %s1629_s18 }
 0x439   : > { %p1632_p12 = scmp.lt.s32.totalorder %s1630_s20, %s1626_s30 }
 0x43b   : > { %p1633_p13 = por %p1632_p12, %p1631_p11 }
 0x43d   : > { %p1634_p0 = pnand %p1633_p13, %p1627_p10 }
 0x43f   : > { %1637 = shalt.err (!%p1634_p0)
}
 0x440   : > { %s1638_s23 = scalar_lea.hbm %s2106_s28, 32  ;;  %s1640_s12 = scalar_lea.hbm %s2169_s9, 64 }
 0x441   : > { %p1639_p1 = scmp.ne.s32.totalorder %s2106_s28, %s1638_s23  ;;  %p1641_p2 = scmp.lt.u32.totalorder %s2106_s28, %s2169_s9 }
 0x442   : > { %p1642_p3 = scmp.lt.u32.totalorder %s1640_s12, %s1638_s23  ;;  %p1644_p6 = scmp.lt.u32.totalorder %s1638_s23, %s2106_s28 }
 0x444   : > { %p1643_p5 = por %p1642_p3, %p1641_p2 }
 0x446   : > { %p1645_p7 = por %p1644_p6, %p1643_p5 }
 0x448   : > { %p1646_p8 = pnand %p1645_p7, %p1639_p1 }
 0x44a   : > { %1649 = shalt.err (!%p1646_p8)
}
 0x44b   : > { %1142 = dma.vmem_to_hbm [thread:$0]  %s1140_s21, 32, %s2106_s28, %s1025_s26  }
 0x44c PF: > { %s2189_s29 = sadd.s32 4294967294, %s1692_s11  }
 0x44d   : > { %s1162_s25 = sand.u32 1, %s2189_s29  }
 0x44e   : > { %s1163_s19 = scalar_lea.sflag [#allocation14], %s1162_s25 }
 0x44f   : > { %1671 = dma.done.wait (%p1440_p4), %s1163_s19, 32  }
 0x450   : > { %1673 = vsyncadd (%p1440_p4), %s1163_s19, 4294967264  ;;  %s1169_s22 = scalar_lea.sflag [#allocation17], %s1162_s25 }
 0x451   : > { %1675 = dma.done.wait (%p1440_p4), %s1169_s22, 64  }
 0x452   : > { %1677 = vsyncadd (%p1440_p4), %s1169_s22, 4294967232  ;;  %s1181_s13 = scalar_lea.sflag [#allocation22], %s1162_s25 }
 0x453   : > { %1679 = dma.done.wait (%p1440_p4), %s1181_s13, 32  }
 0x454   : > { %1681 = vsyncadd (%p1440_p4), %s1181_s13, 4294967264  ;;  %s2190_s26 = sld [smem:[#allocation39_spill]]  ;;  %p22_p9 = scmp.ge.s32.totalorder %s1779_s14, 4  }
 0x455   : > { %s2191_s30 = smov %s1688_s10  ;;  %s2193_s11 = smov %s1779_s14 }
 0x456   :  { %24 = sbr.rel (!%p22_p9) target bundleno = 10 (0xa), region = 366 }
 0x45a   : > { %s2192_s10 = smov %s2190_s26 }
 0x45d   :  { %1186 = vsyncpa [#allocation14], 1 }
 0x45e   :  { %1188 = vsyncpa [#allocation14 + $0x1], 1 }
 0x45f   :  { %1189 = vsyncpa [#allocation17], 1 }
 0x460   :  { %1191 = vsyncpa [#allocation17 + $0x1], 1 }
 0x461   :  { %1192 = vsyncpa [#allocation22], 1 }
 0x462   :  { %1194 = vsyncpa [#allocation22 + $0x1], 1 }

// kernel: reverse
= control target key start
LH: loop header
LB: loop body
LE: loop exit
PB: predicated region body
PF: predicated region fallthrough
CT: control target
= control target key end

     0   :  { %v2_v0 = vlaneseq  ;;  %s105_s0 = inlined_call_operand.vmem [shape: f32[2,3], index: 0, kind: input, shape index: {}]   ;;  %s106_s1 = inlined_call_operand.vmem [shape: f32[2,3], index: 1, kind: output, shape index: {}]  }
   0x2   :  { %v3_v1 = vsub.s32 2, %v2_v0 }
   0x4   :  { %4 = vset.pattern.permute.xlu0 %v3_v1 }
   0x5   :  { %v20_v2 = vld [vmem:[%s105_s0] sm:$0x3] }
   0x6   :  { %21 = vst [vmem:[#allocation1] sm:$0x3] %v20_v2 }
   0xd   :  { %v38_v3 = vld [vmem:[#allocation1] sm:$0x3] }
   0xe   :  { %39 = vst [vmem:[#allocation0] sm:$0x3] %v38_v3 }
  0x15   :  { %v40_v4 = vld [vmem:[#allocation0] sm:$0xff] }
  0x16   :  { %41 = vperm.xlu0 %4, %v40_v4  }
  0x95   :  { %v42_v5 = vpop.permute.xlu0 %41 }
  0x96   :  { %43 = vst [vmem:[#allocation2] sm:$0xff] %v42_v5 }
  0x9d   :  { %v47_v6 = vld [vmem:[#allocation2] sm:$0x3] }
  0x9e   :  { %49 = vst [vmem:[#allocation3] sm:$0x3] %v47_v6 }
  0xa5   :  { %v65_v7 = vld [vmem:[#allocation3] sm:$0x3] }
  0xa6   :  { %66 = vst [vmem:[%s106_s1] sm:$0x3] %v65_v7 }

</bundles_post_ra>
